<compile_context>
chip_gen: v6e
topology: v6e:2x2x1
jax: 0.10.0
libtpu: 0.0.40
codegen_flags: <defaults>
</compile_context>

<pallas_src>
import math

import jax
import jax.numpy as jnp
from jax import lax
from jax.experimental import pallas as pl
from jax.experimental.pallas import tpu as pltpu


def _make_kernel(bb, Cin, H, W, fh, fw, Ho, Wo, Cout, pad):
    Wp = W + 2 * pad

    def kernel(x_ref, w_ref, shift_ref, o_ref, *scratch):
        # x_ref    : (bb, Cin, H, W)   unpadded input block
        # w_ref    : (Cout, K)         im2col-ordered weights with BN scale folded in
        # shift_ref: (Cout, 1)         folded conv-bias + BN shift
        # o_ref    : (bb, Cout, Wo)
        # scratch  : (xp_ref,) of shape (bb, Cin, H, Wp) iff pad > 0

        if pad > 0:
            # Zero-pad along W inside the kernel (no jnp.pad / extra HBM traffic).
            # NOTE: re-zeroed every grid step on purpose — the scratch is per-core, so a
            # program_id==0 gate would be wrong under megacore grid splitting.
            xp_ref = scratch[0]
            zeros_edge = jnp.zeros((bb, Cin, H, pad), dtype=xp_ref.dtype)
            xp_ref[:, :, :, 0:pad] = zeros_edge
            xp_ref[:, :, :, pad + W:Wp] = zeros_edge
            xp_ref[:, :, :, pad:pad + W] = x_ref[...]
            src = xp_ref
        else:
            src = x_ref            # no padding needed (e.g. fw == 1): slice x directly

        # im2col patch build: only fw lane-shifted views (hoisted); the kh offsets are
        # cheap sublane slices reused across all kw.  Concatenation is along a leading
        # (untiled) axis, so it is plain block copies — no lane crossings.
        cols = []
        for kw in range(fw):
            xw = src[:, :, :, kw:kw + Wo]               # (bb, Cin, H, Wo)  lane shift
            for kh in range(fh):
                cols.append(xw[:, :, kh:kh + Ho, :])    # (bb, Cin, Ho, Wo) sublane slice
        patches = jnp.concatenate(cols, axis=1)         # (bb, K, Ho, Wo), K = fh*fw*Cin

        w2d = w_ref[...]                                # (Cout, K)
        shift = shift_ref[...]                          # (Cout, 1) -> broadcasts over Wo

        # One MXU matmul per sample with the full K = Cin*fh*fw contraction.
        for b in range(bb):                             # static (unrolled) batch-block loop
            acc = jnp.einsum("ok,khw->ohw", w2d, patches[b],
                             preferred_element_type=jnp.float32)   # (Cout, Ho, Wo)
            # MaxPool2d((freq, 1)) over the full H axis FIRST (exact: shift is constant
            # along H, ReLU is monotone), then BN shift + ReLU on the pooled result only.
            pooled = jnp.max(acc, axis=1)                          # (Cout, Wo)
            o_ref[b] = jnp.maximum(pooled + shift, 0.0).astype(o_ref.dtype)

    return kernel


def _pick_batch_block(N, per_sample_vmem,
                      vmem_budget_bytes=8 * 1024 * 1024, max_bb=16):
    """Largest divisor of N that fits a conservative VMEM budget and (if possible)
    keeps the parallel grid length >= 2 (v7x has two TensorCores)."""
    cap = max(1, min(max_bb, int(vmem_budget_bytes // max(per_sample_vmem, 1))))
    best = 1
    for d in range(1, N + 1):
        if N % d == 0 and d <= cap and (N // d >= 2 or N == 1):
            best = d
    return best


def conv_v_forward(x, weight, bias, gamma, beta, run_mean, run_var,
                   eps=1e-5, compute_dtype=None):
    """Pallas implementation of Conv_V.forward (BatchNorm in inference mode).

    compute_dtype: optionally cast x / weights (e.g. jnp.bfloat16 on v6e/v7x) —
    accumulation stays f32.  Default keeps the input dtype (exact f32 path).
    """
    N, Cin, H, W = x.shape
    Cout, _, fh, fw = weight.shape
    pad = fw // 2
    Wp = W + 2 * pad
    Ho = H - fh + 1                 # padding=(0, fw//2): no padding along H
    Wo = W + 2 * pad - fw + 1
    K = fh * fw * Cin

    # Fold conv bias + BN running stats:  BN(conv(x,w)+b) = conv(x, w*scale) + shift
    inv_std = 1.0 / jnp.sqrt(run_var.astype(jnp.float32) + eps)
    scale = gamma.astype(jnp.float32) * inv_std                                 # (Cout,)
    shift = ((bias.astype(jnp.float32) - run_mean.astype(jnp.float32)) * scale
             + beta.astype(jnp.float32)).reshape(Cout, 1)
    w_scaled = weight.astype(jnp.float32) * scale[:, None, None, None]

    # im2col weight layout: k = (kw*fh + kh)*Cin + c  (matches in-kernel patch order).
    w2d = jnp.transpose(w_scaled, (0, 3, 2, 1)).reshape(Cout, K)

    x_in = x if compute_dtype is None else x.astype(compute_dtype)
    if compute_dtype is not None:
        w2d = w2d.astype(compute_dtype)

    itemsize = jnp.dtype(x_in.dtype).itemsize
    per_sample_vmem = (
        2 * Cin * H * W * itemsize          # double-buffered input block
        + (Cin * H * Wp * itemsize if pad > 0 else 0)   # padded scratch
        + K * Ho * Wo * itemsize            # im2col patches
        + 4 * Cout * Ho * Wo                # f32 matmul accumulator
        + 2 * Cout * Wo * itemsize)         # double-buffered output block
    bb = _pick_batch_block(N, per_sample_vmem)
    assert N % bb == 0
    # TODO(synk): for very long time axes (huge Wo) a second grid axis tiling W with a
    # (fw-1)-column halo would be needed to bound the f32 accumulator in VMEM.

    kernel = _make_kernel(bb, Cin, H, W, fh, fw, Ho, Wo, Cout, pad)

    scratch_shapes = []
    if pad > 0:
        scratch_shapes.append(pltpu.VMEM((bb, Cin, H, Wp), x_in.dtype))

    flops = 2 * N * Cout * K * Ho * Wo
    bytes_accessed = (x_in.size * itemsize
                      + w2d.size * jnp.dtype(w2d.dtype).itemsize
                      + shift.size * 4
                      + N * Cout * Wo * jnp.dtype(x.dtype).itemsize)

    out = pl.pallas_call(
        kernel,
        out_shape=jax.ShapeDtypeStruct((N, Cout, Wo), x.dtype),
        grid_spec=pltpu.PrefetchScalarGridSpec(
            num_scalar_prefetch=0,
            grid=(N // bb,),
            in_specs=[
                pl.BlockSpec((bb, Cin, H, W), lambda n: (n, 0, 0, 0)),
                pl.BlockSpec((Cout, K), lambda n: (0, 0)),
                pl.BlockSpec((Cout, 1), lambda n: (0, 0)),
            ],
            out_specs=pl.BlockSpec((bb, Cout, Wo), lambda n: (n, 0, 0)),
            scratch_shapes=scratch_shapes,
        ),
        compiler_params=pltpu.CompilerParams(
            dimension_semantics=("parallel",),
            vmem_limit_bytes=32 * 1024 * 1024),
        cost_estimate=pl.CostEstimate(
            flops=flops, transcendentals=0, bytes_accessed=bytes_accessed),
    )(x_in, w2d, shift)
    return out


def _reference(x, weight, bias, gamma, beta, run_mean, run_var, eps=1e-5):
    """Pure-JAX reference mirroring the PyTorch module (eval-mode BN)."""
    pad = weight.shape[-1] // 2
    conv = lax.conv_general_dilated(
        x, weight, window_strides=(1, 1),
        padding=((0, 0), (pad, pad)),
        dimension_numbers=("NCHW", "OIHW", "NCHW"))
    conv = conv + bias[None, :, None, None]
    bn = (conv - run_mean[None, :, None, None]) / jnp.sqrt(
        run_var[None, :, None, None] + eps)
    bn = bn * gamma[None, :, None, None] + beta[None, :, None, None]
    act = jnp.maximum(bn, 0.0)
    return jnp.max(act, axis=2)   # MaxPool over full freq axis + squeeze(2)


if __name__ == "__main__":
    # Small deterministic config: batch=2, Cin=4, Cout=8, spatial 16x16, filter 3x3.
    N, Cin, Cout, H, W = 2, 4, 8, 16, 16
    fh, fw = 3, 3
    Wo = W + 2 * (fw // 2) - fw + 1   # == W for odd fw

    key = jax.random.PRNGKey(0)
    kx, kw_, kb, kg, kbe, km, kv = jax.random.split(key, 7)

    x = jax.random.normal(kx, (N, Cin, H, W), dtype=jnp.float32)

    # Deterministic parameter init (PyTorch-ish kaiming-uniform bound for conv).
    fan_in = Cin * fh * fw
    bound = 1.0 / math.sqrt(fan_in)
    weight = jax.random.uniform(kw_, (Cout, Cin, fh, fw),
                                minval=-bound, maxval=bound, dtype=jnp.float32)
    bias = jax.random.uniform(kb, (Cout,), minval=-bound, maxval=bound,
                              dtype=jnp.float32)

    # BatchNorm2d params / running stats (inference mode), non-trivial values.
    # TODO(synk): training-mode BatchNorm (per-forward batch statistics) is not
    # implemented; inference-mode running statistics are used instead.
    gamma = 1.0 + 0.1 * jax.random.normal(kg, (Cout,), dtype=jnp.float32)
    beta = 0.1 * jax.random.normal(kbe, (Cout,), dtype=jnp.float32)
    run_mean = 0.1 * jax.random.normal(km, (Cout,), dtype=jnp.float32)
    run_var = 1.0 + 0.1 * jax.random.uniform(kv, (Cout,), dtype=jnp.float32)

    out = conv_v_forward(x, weight, bias, gamma, beta, run_mean, run_var)
    out = jax.block_until_ready(out)

    ref = _reference(x, weight, bias, gamma, beta, run_mean, run_var)
    assert out.shape == (N, Cout, Wo), out.shape
    assert jnp.allclose(out, ref, atol=1e-5, rtol=1e-5), float(
        jnp.max(jnp.abs(out - ref)))

    print("KERNEL_OK")
</pallas_src>

<mosaic_0001>
module attributes {stable_mosaic.version = 11 : i64} {
  func.func @kernel(%arg0: i32, %arg1: memref<1x4x16x16xf32, #tpu.memory_space<vmem>>, %arg2: memref<8x36xf32, #tpu.memory_space<vmem>>, %arg3: memref<8x1xf32, #tpu.memory_space<vmem>>, %arg4: memref<1x8x16xf32, #tpu.memory_space<vmem>>, %arg5: memref<1x4x16x18xf32, #tpu.memory_space<vmem>>) attributes {dimension_semantics = [#tpu.dimension_semantics<parallel>], iteration_bounds = array<i64: 2>, scalar_prefetch = 0 : i64, scratch_operands = 1 : i64, tpu.core_type = #tpu.core_type<tc>, window_params = [{transform_indices = @transform_0, window_bounds = array<i64: 1, 4, 16, 16>}, {pipeline_mode = #tpu.pipeline_mode<synchronous>, transform_indices = @transform_1, window_bounds = array<i64: 8, 36>}, {pipeline_mode = #tpu.pipeline_mode<synchronous>, transform_indices = @transform_2, window_bounds = array<i64: 8, 1>}, {transform_indices = @transform_3, window_bounds = array<i64: 1, 8, 16>}]} {
    %cst = arith.constant 0.000000e+00 : f32
    %0 = vector.broadcast %cst : f32 to vector<1x4x16x1xf32>
    %c0 = arith.constant 0 : index
    %c0_0 = arith.constant 0 : index
    %c0_1 = arith.constant 0 : index
    %c0_2 = arith.constant 0 : index
    %1 = vector.load %arg5[%c0, %c0_0, %c0_1, %c0_2] : memref<1x4x16x18xf32, #tpu.memory_space<vmem>>, vector<1x4x16x1xf32>
    tpu.vector_store %arg5[%c0, %c0_0, %c0_1, %c0_2], %0 {strides = array<i32>} : memref<1x4x16x18xf32, #tpu.memory_space<vmem>>, vector<1x4x16x1xf32>,
    %c0_3 = arith.constant 0 : index
    %c0_4 = arith.constant 0 : index
    %c0_5 = arith.constant 0 : index
    %c17 = arith.constant 17 : index
    %2 = vector.load %arg5[%c0_3, %c0_4, %c0_5, %c17] : memref<1x4x16x18xf32, #tpu.memory_space<vmem>>, vector<1x4x16x1xf32>
    tpu.vector_store %arg5[%c0_3, %c0_4, %c0_5, %c17], %0 {strides = array<i32>} : memref<1x4x16x18xf32, #tpu.memory_space<vmem>>, vector<1x4x16x1xf32>,
    %c0_6 = arith.constant 0 : index
    %c0_7 = arith.constant 0 : index
    %c0_8 = arith.constant 0 : index
    %c0_9 = arith.constant 0 : index
    %3 = vector.load %arg1[%c0_6, %c0_7, %c0_8, %c0_9] : memref<1x4x16x16xf32, #tpu.memory_space<vmem>>, vector<1x4x16x16xf32>
    %c0_10 = arith.constant 0 : index
    %c0_11 = arith.constant 0 : index
    %c0_12 = arith.constant 0 : index
    %c1 = arith.constant 1 : index
    %4 = vector.load %arg5[%c0_10, %c0_11, %c0_12, %c1] : memref<1x4x16x18xf32, #tpu.memory_space<vmem>>, vector<1x4x16x16xf32>
    tpu.vector_store %arg5[%c0_10, %c0_11, %c0_12, %c1], %3 {strides = array<i32>} : memref<1x4x16x18xf32, #tpu.memory_space<vmem>>, vector<1x4x16x16xf32>,
    %c0_13 = arith.constant 0 : index
    %c0_14 = arith.constant 0 : index
    %c0_15 = arith.constant 0 : index
    %c0_16 = arith.constant 0 : index
    %5 = vector.load %arg5[%c0_13, %c0_14, %c0_15, %c0_16] : memref<1x4x16x18xf32, #tpu.memory_space<vmem>>, vector<1x4x16x16xf32>
    %6 = vector.extract_strided_slice %5 {offsets = [0, 0, 0, 0], sizes = [1, 4, 14, 16], strides = [1, 1, 1, 1]} : vector<1x4x16x16xf32> to vector<1x4x14x16xf32>
    %7 = vector.extract_strided_slice %5 {offsets = [0, 0, 1, 0], sizes = [1, 4, 14, 16], strides = [1, 1, 1, 1]} : vector<1x4x16x16xf32> to vector<1x4x14x16xf32>
    %8 = vector.extract_strided_slice %5 {offsets = [0, 0, 2, 0], sizes = [1, 4, 14, 16], strides = [1, 1, 1, 1]} : vector<1x4x16x16xf32> to vector<1x4x14x16xf32>
    %c0_17 = arith.constant 0 : index
    %c0_18 = arith.constant 0 : index
    %c0_19 = arith.constant 0 : index
    %c1_20 = arith.constant 1 : index
    %9 = vector.load %arg5[%c0_17, %c0_18, %c0_19, %c1_20] : memref<1x4x16x18xf32, #tpu.memory_space<vmem>>, vector<1x4x16x16xf32>
    %10 = vector.extract_strided_slice %9 {offsets = [0, 0, 0, 0], sizes = [1, 4, 14, 16], strides = [1, 1, 1, 1]} : vector<1x4x16x16xf32> to vector<1x4x14x16xf32>
    %11 = vector.extract_strided_slice %9 {offsets = [0, 0, 1, 0], sizes = [1, 4, 14, 16], strides = [1, 1, 1, 1]} : vector<1x4x16x16xf32> to vector<1x4x14x16xf32>
    %12 = vector.extract_strided_slice %9 {offsets = [0, 0, 2, 0], sizes = [1, 4, 14, 16], strides = [1, 1, 1, 1]} : vector<1x4x16x16xf32> to vector<1x4x14x16xf32>
    %c0_21 = arith.constant 0 : index
    %c0_22 = arith.constant 0 : index
    %c0_23 = arith.constant 0 : index
    %c2 = arith.constant 2 : index
    %13 = vector.load %arg5[%c0_21, %c0_22, %c0_23, %c2] : memref<1x4x16x18xf32, #tpu.memory_space<vmem>>, vector<1x4x16x16xf32>
    %14 = vector.extract_strided_slice %13 {offsets = [0, 0, 0, 0], sizes = [1, 4, 14, 16], strides = [1, 1, 1, 1]} : vector<1x4x16x16xf32> to vector<1x4x14x16xf32>
    %15 = vector.extract_strided_slice %13 {offsets = [0, 0, 1, 0], sizes = [1, 4, 14, 16], strides = [1, 1, 1, 1]} : vector<1x4x16x16xf32> to vector<1x4x14x16xf32>
    %16 = vector.extract_strided_slice %13 {offsets = [0, 0, 2, 0], sizes = [1, 4, 14, 16], strides = [1, 1, 1, 1]} : vector<1x4x16x16xf32> to vector<1x4x14x16xf32>
    %17 = tpu.concatenate %6, %7, %8, %10, %11, %12, %14, %15, %16 in 1 : vector<1x4x14x16xf32>, vector<1x4x14x16xf32>, vector<1x4x14x16xf32>, vector<1x4x14x16xf32>, vector<1x4x14x16xf32>, vector<1x4x14x16xf32>, vector<1x4x14x16xf32>, vector<1x4x14x16xf32>, vector<1x4x14x16xf32> -> vector<1x36x14x16xf32>
    %c0_24 = arith.constant 0 : index
    %c0_25 = arith.constant 0 : index
    %18 = vector.load %arg2[%c0_24, %c0_25] : memref<8x36xf32, #tpu.memory_space<vmem>>, vector<8x36xf32>
    %c0_26 = arith.constant 0 : index
    %c0_27 = arith.constant 0 : index
    %19 = vector.load %arg3[%c0_26, %c0_27] : memref<8x1xf32, #tpu.memory_space<vmem>>, vector<8x1xf32>
    %20 = vector.shape_cast %17 : vector<1x36x14x16xf32> to vector<36x14x16xf32>
    "tpu.trace_start"() <{level = 10 : i32, message = "ok,khw->ohw"}> : () -> ()
    %cst_28 = arith.constant dense<0.000000e+00> : vector<8x14x16xf32>
    %21 = tpu.matmul %18, %20, %cst_28 {dimension_numbers = #tpu.dot_dimension_numbers<[1], [0], [0], [1, 2], [0, 0, 1, 1, 1, 2], [], []>} : vector<8x36xf32>, vector<36x14x16xf32>, vector<8x14x16xf32> -> vector<8x14x16xf32>
    "tpu.trace_stop"() : () -> ()
    %cst_29 = arith.constant dense<0xFF800000> : vector<8x16xf32>
    %22 = vector.multi_reduction <maximumf>, %21, %cst_29 [1] : vector<8x14x16xf32> to vector<8x16xf32>
    %23 = vector.broadcast %19 : vector<8x1xf32> to vector<8x16xf32>
    %24 = arith.addf %22, %23 : vector<8x16xf32>
    %cst_30 = arith.constant 0.000000e+00 : f32
    %25 = vector.broadcast %cst_30 : f32 to vector<8x16xf32>
    %26 = arith.maximumf %24, %25 : vector<8x16xf32>
    %c0_31 = arith.constant 0 : index
    %c0_32 = arith.constant 0 : index
    %c0_33 = arith.constant 0 : index
    %27 = vector.load %arg4[%c0_31, %c0_32, %c0_33] : memref<1x8x16xf32, #tpu.memory_space<vmem>>, vector<1x8x16xf32>
    %28 = vector.shape_cast %27 : vector<1x8x16xf32> to vector<8x16xf32>
    %29 = vector.shape_cast %26 : vector<8x16xf32> to vector<1x8x16xf32>
    tpu.vector_store %arg4[%c0_31, %c0_32, %c0_33], %29 {strides = array<i32>} : memref<1x8x16xf32, #tpu.memory_space<vmem>>, vector<1x8x16xf32>,
    return
  }
  func.func @transform_0(%arg0: i32) -> (i32, i32, i32, i32) {
    %c0_i32 = arith.constant 0 : i32
    %c0_i32_0 = arith.constant 0 : i32
    %c0_i32_1 = arith.constant 0 : i32
    %c0_i32_2 = arith.constant 0 : i32
    return %arg0, %c0_i32, %c0_i32_0, %c0_i32_1 : i32, i32, i32, i32
  }
  func.func @transform_1(%arg0: i32) -> (i32, i32) {
    %c0_i32 = arith.constant 0 : i32
    %c0_i32_0 = arith.constant 0 : i32
    %c0_i32_1 = arith.constant 0 : i32
    return %c0_i32, %c0_i32_0 : i32, i32
  }
  func.func @transform_2(%arg0: i32) -> (i32, i32) {
    %c0_i32 = arith.constant 0 : i32
    %c0_i32_0 = arith.constant 0 : i32
    %c0_i32_1 = arith.constant 0 : i32
    return %c0_i32, %c0_i32_0 : i32, i32
  }
  func.func @transform_3(%arg0: i32) -> (i32, i32, i32) {
    %c0_i32 = arith.constant 0 : i32
    %c0_i32_0 = arith.constant 0 : i32
    %c0_i32_1 = arith.constant 0 : i32
    return %arg0, %c0_i32, %c0_i32_0 : i32, i32, i32
  }
}

</mosaic_0001>

<bundles_post_ra>
// kernel: tpu_custom_call.1
= control target key start
LH: loop header
LB: loop body
LE: loop exit
PB: predicated region body
PF: predicated region fallthrough
CT: control target
= control target key end

     0   :  { %8 = vsyncpa [#allocation4], 0  ;;  %s4096_s0 = inlined_call_operand.hbm [shape: f32[2,4,16,16], index: 0, kind: input, shape index: {}]   ;;  %s4097_s1 = inlined_call_operand.vmem [shape: f32[8,36], index: 1, kind: input, shape index: {}]   ;;  %s4098_s2 = inlined_call_operand.vmem [shape: f32[8,1], index: 2, kind: input, shape index: {}]   ;;  %s4099_s3 = inlined_call_operand.hbm [shape: f32[2,8,16], index: 3, kind: output, shape index: {}]  }
   0x1   :  { %10 = vsyncpa [#allocation4 + $0x1], 0 }
   0x2   :  { %11 = vsyncpa [#allocation5], 0 }
   0x3   :  { %13 = vsyncpa [#allocation5 + $0x1], 0  ;;  %s2816_s12 = smov 0   ;;  %s2818_s13 = smov 0  }
   0x4   :  { %s2820_s14 = smov 0   ;;  %s2822_s15 = smov 0  }
   0x5 LB: > { %s2837_s16 = sadd.s32 4294967295, %s2776_s15   ;;  %s2603_s17 = sadd.s32 4294967294, %s2776_s15   ;;  %s2776_s15 = sphi %s2822_s15, %s4141_s15   ;;  %s2772_s14 = sphi %s2820_s14, %s4140_s14   ;;  %s2768_s13 = sphi %s2818_s13, %s4139_s13   ;;  %s2764_s12 = sphi %s2816_s12, %s4138_s12  }
   0x6   : > { %s2841_s18 = sadd.s32 1, %s2776_s15   ;;  %s26_s19 = sadd.s32 1, %s2772_s14 }
   0x7   : > { %s23_s20 = ssub.s32 %s2776_s15, %s2841_s18  ;;  %p33_p0 = scmp.ne.s32.totalorder %s2772_s14, %s2768_s13 }
   0x8   : > { %p24_p1 = scmp.eq.s32.totalorder %s23_s20, 0  ;;  %p34_p2 = scmp.eq.s32.totalorder %s2776_s15, 0 }
   0x9   : > { %p39_p3 = scmp.ne.s32.totalorder %s2768_s13, %s2764_s12  ;;  %p40_p4 = scmp.eq.s32.totalorder %s2837_s16, 0 }
   0xa   : > { %s2853_s21 = scalar_select %p24_p1, %s2772_s14, %s26_s19  }
   0xb   : > { %p2855_p5 = por %p34_p2, %p33_p0  ;;  %p2859_p6 = por %p40_p4, %p39_p3 }
   0xc   : > { %p105_p7 = scmp.eq.s32.totalorder %s2837_s16, 1  ;;  %p111_p8 = scmp.eq.s32.totalorder %s2603_s17, 1 }
   0xd   : > { %s4109_s23 = scalar_select %p2859_p6, 1, 0 }
   0xe   : > { %p2632_p10 = scmp.lt.s32.totalorder %s2776_s15, 2  ;;  %p2866_p11 = por %p105_p7, %p33_p0 }
   0xf   : > { %p2870_p12 = por %p111_p8, %p39_p3  ;;  %s137_s26 = sand.u32 1, %s2772_s14  }
  0x10   : > { %s4110_s24 = scalar_select %p2866_p11, 1, 0 }
  0x11   : > { %s4111_s25 = scalar_select %p2870_p12, 1, 0 }
  0x12   : > { %s2619_s27 = sshll.u32 %s2776_s15, 10  ;;  %s2606_s28 = sshll.u32 %s137_s26, 6 }
  0x13   : > { %s2879_s4 = scalar_lea.hbm %s4096_s0, %s2619_s27  ;;  %s141_s5 = scalar_lea.vmem [#allocation3], %s2606_s28 }
  0x14   : > { %s148_s6 = sshll.u32 %s141_s5, 4  ;;  %p2883_p13 = pnand %p2632_p10, %p2855_p5  ;;  %s2887_s6 = int_to_ptr.vmem [resolvable:$true] %s148_s6 }
  0x15   : > { %s2889_s8 = scalar_lea.sflag [#allocation4], %s137_s26  ;;  %s2684_s9 = scalar_lea.hbm %s2879_s4, 1024 }
  0x16   : > { %p2685_p0 = scmp.ne.s32.totalorder %s2879_s4, %s2684_s9  ;;  %p2686_p1 = pneg %p2883_p13 }
  0x17   : > { %s2689_s17 = scalar_lea.hbm %s4096_s0, 2048  ;;  %p2690_p4 = scmp.lt.s32.totalorder %s2879_s4, %s4096_s0 }
  0x18   : > { %p2687_p2 = pnand %p2686_p1, %p2685_p0  ;;  %p2691_p5 = scmp.lt.s32.totalorder %s2689_s17, %s2684_s9 }
  0x1a   : > { %p2688_p3 = pneg %p2687_p2  ;;  %p2692_p7 = por %p2691_p5, %p2690_p4 }
  0x1c   : > { %p2693_p8 = pnand %p2692_p7, %p2688_p3 }
  0x1e   : > { %2696 = shalt.err (!%p2693_p8)
}
  0x1f   : > { %s2697_s22 = scalar_lea.vmem %s2887_s6, 1024  ;;  %s2778_s26 = smov [#allocation3]  }
  0x20   : > { %p2698_p10 = scmp.ne.s32.totalorder %s2887_s6, %s2697_s22  ;;  %s2702_s27 = sshll.u32 %s2778_s26, 4  ;;  %s2703_s27 = int_to_ptr.vmem [resolvable:$false] %s2702_s27 }
  0x21   : > { %s2704_s28 = scalar_lea.vmem %s2703_s27, 2048  ;;  %p2705_p2 = scmp.lt.s32.totalorder %s2887_s6, %s2703_s27 }
  0x22   : > { %p2700_p9 = pnand %p2698_p10, %p2686_p1  ;;  %p2706_p12 = scmp.lt.s32.totalorder %s2704_s28, %s2697_s22 }
  0x24   : > { %p2701_p0 = pneg %p2700_p9  ;;  %p2707_p11 = por %p2706_p12, %p2705_p2 }
  0x26   : > { %p2708_p6 = pnand %p2707_p11, %p2701_p0 }
  0x28   : > { %2711 = shalt.err (!%p2708_p6)
}
  0x29   : > { %s2779_s29 = smov 128   ;;  %s2780_s30 = smov 8  }
  0x2a   : > { %2627 = dma.hbm_to_vmem [thread:$0]  (!%p2883_p13), %s2879_s4, 1024, %s2887_s6, %s2889_s8, %s2779_s29, %s2779_s29, %s2780_s30  }
  0x2b   : > { %p2609_p9 = scmp.ge.s32.totalorder %s2776_s15, 1  ;;  %p156_p1 = scmp.lt.s32.totalorder %s2776_s15, 3 }
  0x2d   : > { %p157_p3 = pnand %p2609_p9, %p156_p1 }
  0x2f   : > { %160 = sbr.rel (%p157_p3) target bundleno = 954 (0x3ba), region = 32 }
  0x34   : > { %s2913_s5 = sand.u32 1, %s2768_s13   ;;  %p4113_p6 = scmp.ne.s32.totalorder %s4109_s23, 0 }
  0x35   : > { %s2610_s9 = sshll.u32 %s2913_s5, 6  ;;  %s163_s10 = scalar_lea.sflag [#allocation4], %s2913_s5 }
  0x36   : > { %s2917_s11 = scalar_lea.vmem [#allocation3], %s2610_s9 }
  0x37   : > { %2755 = dma.done.wait (%p4113_p6), %s163_s10, 1024  }
  0x38   : > { %2757 = vsyncadd (%p4113_p6), %s163_s10, 4294966272  ;;  %vm189_vm0 = vcmask 7168   ;;  %vm198_vm1 = vcmask 146568   ;;  %v4102_v0 = vmov 0.0   ;;  %v209_v1 = vld [vmem:[%s2917_s11 + $0x10] sm:$0xff]  ;;  %v207_v2 = vld [vmem:[%s2917_s11] sm:$0xff]  ;;  %v465_v22 = vlaneseq }
  0x39   : > { %192 = vst.msk [vmem:[#allocation2 + $0x10] sm:$0xff] %vm189_vm0, %v4102_v0  ;;  %190 = vst.msk [vmem:[#allocation2] sm:$0xff] %vm189_vm0, %v4102_v0  ;;  %2065 = vmatprep.mubr.f32.mxu0 %v4102_v0  ;;  %s2782_s23 = smov 1   ;;  %v210_v3 = vld [vmem:[%s2917_s11 + $0x18] sm:$0xff]  ;;  %v208_v4 = vld [vmem:[%s2917_s11 + $0x8] sm:$0xff]  ;;  %vm247_vm2 = vcmask 138248  }
  0x3a   : > { %191 = vst.msk [vmem:[#allocation2 + $0x8] sm:$0xff] %vm189_vm0, %v4102_v0  ;;  %193 = vst.msk [vmem:[#allocation2 + $0x18] sm:$0xff] %vm189_vm0, %v4102_v0  ;;  %227 = vrot.lane.b32.xlu1 %v209_v1, %s2782_s23  ;;  %223 = vrot.lane.b32.xlu0 %v207_v2, %s2782_s23  ;;  %v212_v5 = vld [vmem:[%s2917_s11 + $0x28] sm:$0xff]  ;;  %v211_v6 = vld [vmem:[%s2917_s11 + $0x20] sm:$0xff]  ;;  %s2783_s4 = smov 126   ;;  %vm272_vm3 = vcmask 1046528  }
  0x3b   : > { %194 = vst.msk [vmem:[#allocation2 + $0x20] sm:$0xff] %vm189_vm0, %v4102_v0  ;;  %195 = vst.msk [vmem:[#allocation2 + $0x28] sm:$0xff] %vm189_vm0, %v4102_v0  ;;  %v214_v7 = vld [vmem:[%s2917_s11 + $0x38] sm:$0xff]  ;;  %v213_v8 = vld [vmem:[%s2917_s11 + $0x30] sm:$0xff]  ;;  %v2784_v20 = vmov 1983009808  }
  0x3c   : > { %196 = vst.msk [vmem:[#allocation2 + $0x30] sm:$0xff] %vm189_vm0, %v4102_v0  ;;  %197 = vst.msk [vmem:[#allocation2 + $0x38] sm:$0xff] %vm189_vm0, %v4102_v0  ;;  %v463_v21 = vunpack.c.l.s4 %v2784_v20  ;;  %v466_v28 = vshrl.u32 %v465_v22, 7  ;;  %v2785_v50 = vmov 1934713408   ;;  %s2786_s6 = smov 127  }
  0x3d   : > { %201 = vst.msk [vmem:[#allocation2 + $0x10] sm:$0xff] %vm198_vm1, %v4102_v0  ;;  %199 = vst.msk [vmem:[#allocation2] sm:$0xff] %vm198_vm1, %v4102_v0  ;;  %v527_v51 = vunpack.c.l.s4 %v2785_v50  ;;  %vm293_vm4 = vcmask 1045504   ;;  %s2787_s7 = smov 16   ;;  %s2788_s8 = smov 32   ;;  %vm1843_vm5 = vcmask 130048  }
  0x3e   : > { %200 = vst.msk [vmem:[#allocation2 + $0x8] sm:$0xff] %vm198_vm1, %v4102_v0  ;;  %202 = vst.msk [vmem:[#allocation2 + $0x18] sm:$0xff] %vm198_vm1, %v4102_v0  ;;  %229 = vrot.lane.b32.xlu1 %v210_v3, %s2782_s23  ;;  %225 = vrot.lane.b32.xlu0 %v208_v4, %s2782_s23  ;;  %v464_v27 = vunpack.c.0.s8 %v463_v21  ;;  %s2789_s17 = smov 48   ;;  %s2790_s19 = smov 64   ;;  %vm1849_vm6 = vcmask 261120   ;;  %vm1855_vm7 = vcmask 392192  }
  0x3f   : > { %203 = vst.msk [vmem:[#allocation2 + $0x20] sm:$0xff] %vm198_vm1, %v4102_v0  ;;  %204 = vst.msk [vmem:[#allocation2 + $0x28] sm:$0xff] %vm198_vm1, %v4102_v0  ;;  %v528_v58 = vunpack.c.0.s8 %v527_v51  ;;  %s2791_s20 = smov 80   ;;  %s2792_s22 = smov 96   ;;  %vm1861_vm8 = vcmask 523264   ;;  %vm1867_vm9 = vcmask 654336  }
  0x40   : > { %205 = vst.msk [vmem:[#allocation2 + $0x30] sm:$0xff] %vm198_vm1, %v4102_v0  ;;  %206 = vst.msk [vmem:[#allocation2 + $0x38] sm:$0xff] %vm198_vm1, %v4102_v0  ;;  %v3033_v48 = vsub.s32 %v464_v27, %v466_v28  ;;  %s2793_s26 = smov 112   ;;  %vm1873_vm10 = vcmask 785408   ;;  %vm1879_vm11 = vcmask 916480   ;;  %vm1994_vm12 = vcmask 1043456  }
  0x41   : > { %vm1990_vm13 = vcmask 293888   ;;  %vm2381_vm14 = vcmask 128000   ;;  %s2611_s9 = sshll.u32 %s2913_s5, 3  ;;  %vm2497_vm15 = vcmask 1041409   ;;  %vm2500_vm0 = vcmask 1042434   ;;  %s2616_s10 = sshll.u32 %s2837_s16, 7 }
  0x42   : > { %233 = vrot.lane.b32.xlu1 %v212_v5, %s2782_s23  ;;  %231 = vrot.lane.b32.xlu0 %v211_v6, %s2782_s23  ;;  %vm2503_vm1 = vcmask 1043459   ;;  %s188_s11 = scalar_lea.vmem [#allocation6], %s2611_s9  ;;  %p4135_p12 = scmp.ne.s32.totalorder %s4110_s24, 0 }
  0x46   : > { %237 = vrot.lane.b32.xlu1 %v214_v7, %s2782_s23  ;;  %235 = vrot.lane.b32.xlu0 %v213_v8, %s2782_s23  ;;  %s2533_s23 = sshll.u32 %s188_s11, 4  ;;  %s2534_s23 = int_to_ptr.vmem [resolvable:$true] %s2533_s23 }
  0x47   : > { %s2712_s16 = scalar_lea.vmem %s2534_s23, 128 }
  0x48   : > { %p2713_p11 = scmp.ne.s32.totalorder %s2534_s23, %s2712_s16 }
  0x4a   : > { %p2714_p13 = pnand %p2713_p11, %p4135_p12 }
  0x4c   : > { %p2715_p4 = pneg %p2714_p13 }
  0xac   : > { %v228_v9 = vpop.permute.xlu1 %227  ;;  %v224_v10 = vpop.permute.xlu0 %223 }
  0xad   : > { %250 = vst.msk [vmem:[#allocation2 + $0x10] sm:$0xff] %vm247_vm2, %v228_v9  ;;  %248 = vst.msk [vmem:[#allocation2] sm:$0xff] %vm247_vm2, %v224_v10  ;;  %v3086_v10 = vsub.s32 %v528_v58, %v466_v28 }
  0xb0   : > { %v230_v11 = vpop.permute.xlu1 %229  ;;  %v226_v12 = vpop.permute.xlu0 %225 }
  0xb1   : > { %251 = vst.msk [vmem:[#allocation2 + $0x18] sm:$0xff] %vm247_vm2, %v230_v11  ;;  %249 = vst.msk [vmem:[#allocation2 + $0x8] sm:$0xff] %vm247_vm2, %v226_v12 }
  0xb4   : > { %v234_v13 = vpop.permute.xlu1 %233  ;;  %v232_v14 = vpop.permute.xlu0 %231  ;;  %v2960_v15 = vld [vmem:[#allocation2] sm:$0xff]  ;;  %v2962_v16 = vld [vmem:[#allocation2 + $0x10] sm:$0xff] }
  0xb5   : > { %253 = vst.msk [vmem:[#allocation2 + $0x28] sm:$0xff] %vm247_vm2, %v234_v13  ;;  %252 = vst.msk [vmem:[#allocation2 + $0x20] sm:$0xff] %vm247_vm2, %v232_v14  ;;  %386 = vrot.lane.b32.xlu0 %v2960_v15, %s2783_s4  ;;  %390 = vrot.lane.b32.xlu1 %v2962_v16, %s2783_s4  ;;  %v273_v29 = vrot.slane %v2960_v15, 1  ;;  %v276_v30 = vrot.slane %v2962_v16, 1 }
  0xb8   : > { %v238_v17 = vpop.permute.xlu1 %237  ;;  %v236_v18 = vpop.permute.xlu0 %235  ;;  %v2970_v19 = vld [vmem:[#allocation2 + $0x8] sm:$0xff]  ;;  %v2979_v25 = vld [vmem:[#allocation2 + $0x18] sm:$0xff] }
  0xb9   : > { %255 = vst.msk [vmem:[#allocation2 + $0x38] sm:$0xff] %vm247_vm2, %v238_v17  ;;  %254 = vst.msk [vmem:[#allocation2 + $0x30] sm:$0xff] %vm247_vm2, %v236_v18  ;;  %v2975_v23 = vrot.slane %v2970_v19, 1  ;;  %v2988_v31 = vrot.slane %v2970_v19, 2  ;;  %v3006_v39 = vrot.slane %v2979_v25, 1  ;;  %v3092_v12 = vrot.slane %v2979_v25, 2 }
  0xba   : > { %vm2506_vm2 = vcmask 1044484  }
  0xbb   : > { %v3010_v40 = vsel %vm272_vm3, %v273_v29, %v2975_v23  ;;  %v3038_v52 = vsel %vm272_vm3, %v276_v30, %v3006_v39 }
  0xbc   : > { %v2977_v24 = vld [vmem:[#allocation2 + $0x20] sm:$0xff]  ;;  %v2981_v26 = vld [vmem:[#allocation2 + $0x28] sm:$0xff] }
  0xbd   : > { %394 = vrot.lane.b32.xlu0 %v2977_v24, %s2783_s4  ;;  %v2991_v32 = vrot.slane %v2981_v26, 2  ;;  %v2994_v33 = vrot.slane %v2981_v26, 1  ;;  %v279_v34 = vrot.slane %v2977_v24, 1  ;;  %v1072_v35 = vcombine.low %v2970_v19, %v2981_v26 }
  0xbe   : > { %v460_v36 = vcombine.low %v2960_v15, %v2977_v24  ;;  %v461_v37 = vcombine.high %v2960_v15, %v2977_v24  ;;  %v1073_v38 = vcombine.high %v2970_v19, %v2981_v26 }
  0xbf   : > { %v3014_v41 = vsel %vm272_vm3, %v279_v34, %v2994_v33  ;;  %v1190_v42 = vcombine.low %v2988_v31, %v2991_v32  ;;  %v1104_v57 = vcombine.low %v2975_v23, %v2994_v33  ;;  %v3057_v59 = vrot.slane %v1072_v35, %v3033_v48 }
  0xc0   : > { %v3018_v43 = vld [vmem:[#allocation2 + $0x30] sm:$0xff]  ;;  %v3020_v44 = vld [vmem:[#allocation2 + $0x38] sm:$0xff]  ;;  %v492_v45 = vcombine.low %v3010_v40, %v3014_v41  ;;  %v493_v46 = vcombine.high %v3010_v40, %v3014_v41  ;;  %v468_v13 = vrot.slane %v460_v36, %v3033_v48  ;;  %v475_v30 = vrot.slane %v461_v37, %v3033_v48 }
  0xc1   : > { %398 = vrot.lane.b32.xlu1 %v3018_v43, %s2783_s4  ;;  %388 = vrot.lane.b32.xlu0 %v2970_v19, %s2783_s4  ;;  %v3031_v47 = vrot.slane %v3020_v44, 1  ;;  %v282_v49 = vrot.slane %v3018_v43, 1  ;;  %v1088_v54 = vcombine.low %v2979_v25, %v3020_v44  ;;  %v3077_v5 = vrot.slane %v3020_v44, 2 }
  0xc2   : > { %v500_v62 = vrot.slane %v492_v45, %v3033_v48  ;;  %v476_v6 = vcombine.low %v2962_v16, %v3018_v43  ;;  %v507_v9 = vrot.slane %v493_v46, %v3033_v48  ;;  %v3089_v11 = vrot.slane %v1104_v57, %v3033_v48 }
  0xc3   : > { %v3042_v53 = vsel %vm272_vm3, %v282_v49, %v3031_v47  ;;  %v3060_v60 = vrot.slane %v1088_v54, %v3033_v48  ;;  %v1120_v61 = vcombine.low %v3006_v39, %v3031_v47  ;;  %v477_v20 = vcombine.high %v2962_v16, %v3018_v43 }
  0xc4   : > { %v508_v55 = vcombine.low %v3038_v52, %v3042_v53  ;;  %v509_v56 = vcombine.high %v3038_v52, %v3042_v53  ;;  %v484_v14 = vrot.slane %v476_v6, %v3033_v48  ;;  %v1206_v29 = vcombine.low %v3092_v12, %v3077_v5 }
  0xc5   : > { %392 = vrot.lane.b32.xlu1 %v2979_v25, %s2783_s4  ;;  %396 = vrot.lane.b32.xlu0 %v2981_v26, %s2783_s4  ;;  %v3070_v2 = vrot.slane %v1120_v61, %v3033_v48  ;;  %v1136_v3 = vcombine.low %v3057_v59, %v3060_v60  ;;  %v1137_v4 = vcombine.high %v3057_v59, %v3060_v60  ;;  %vm2509_vm3 = vcmask 1045509  }
  0xc6   : > { %v516_v63 = vrot.slane %v508_v55, %v3033_v48  ;;  %v3067_v1 = vrot.slane %v509_v56, %v3033_v48  ;;  %v524_v22 = vcombine.low %v468_v13, %v484_v14  ;;  %v525_v27 = vcombine.high %v468_v13, %v484_v14 }
  0xc7   : > { %v1160_v17 = vcombine.low %v3089_v11, %v3070_v2  ;;  %v491_v34 = vrot.slane %v477_v20, %v3033_v48  ;;  %v3125_v49 = vrot.slane %v1190_v42, %v3033_v48  ;;  %v3128_v50 = vrot.slane %v1206_v29, %v3033_v48 }
  0xc8   : > { %v556_v7 = vcombine.low %v500_v62, %v516_v63  ;;  %v557_v8 = vcombine.high %v500_v62, %v516_v63  ;;  %v572_v21 = vcombine.low %v507_v9, %v3067_v1  ;;  %v3116_v35 = vrot.slane %v524_v22, %v3086_v10 }
  0xc9   : > { %400 = vrot.lane.b32.xlu1 %v3020_v44, %s2783_s4  ;;  %314 = vrot.lane.b32.xlu0 %v2960_v15, %s2786_s6  ;;  %v3119_v36 = vrot.slane %v525_v27, %v3086_v10  ;;  %v540_v45 = vcombine.low %v475_v30, %v491_v34  ;;  %v3131_v37 = vrot.slane %v1160_v17, %v3086_v10 }
  0xca   : > { %v3099_v18 = vrot.slane %v556_v7, %v3086_v10  ;;  %v3105_v28 = vrot.slane %v557_v8, %v3086_v10  ;;  %v3122_v46 = vrot.slane %v572_v21, %v3086_v10  ;;  %v1254_v56 = vcombine.low %v3125_v49, %v3128_v50 }
  0xcb   : > { %v3144_v42 = vrot.slane %v540_v45, %v3086_v10  ;;  %v3149_v57 = vrot.slane %v1136_v3, %v3086_v10  ;;  %v1191_v61 = vcombine.high %v2988_v31, %v2991_v32  ;;  %v1207_v6 = vcombine.high %v3092_v12, %v3077_v5 }
  0xcc   : > { %v589_v51 = vcombine.high %v3116_v35, %v3099_v18  ;;  %v590_v54 = vcombine.low %v3119_v36, %v3105_v28  ;;  %v591_v55 = vcombine.high %v3119_v36, %v3105_v28  ;;  %v1089_v14 = vcombine.high %v2979_v25, %v3020_v44 }
  0xcd   : > { %318 = vrot.lane.b32.xlu1 %v2962_v16, %s2786_s6  ;;  %322 = vrot.lane.b32.xlu0 %v2977_v24, %s2786_s6  ;;  %v592_v62 = vcombine.low %v3144_v42, %v3122_v46  ;;  %v593_v63 = vcombine.high %v3144_v42, %v3122_v46  ;;  %v3168_v3 = vrot.slane %v1191_v61, %v3033_v48 }
  0xce   : > { %v3171_v8 = vrot.slane %v1207_v6, %v3033_v48  ;;  %v1105_v17 = vcombine.high %v2975_v23, %v2994_v33  ;;  %v1121_v20 = vcombine.high %v3006_v39, %v3031_v47  ;;  %v541_v22 = vcombine.high %v475_v30, %v491_v34 }
  0xcf   : > { %v573_v27 = vcombine.high %v507_v9, %v3067_v1  ;;  %v1087_v29 = vrot.slane %v1073_v38, %v3033_v48  ;;  %v1103_v45 = vrot.slane %v1089_v14, %v3033_v48 }
  0xd0   : > { %v1135_v61 = vrot.slane %v1121_v20, %v3033_v48  ;;  %v3196_v30 = vrot.slane %v541_v22, %v3086_v10 }
  0xd1   : > { %326 = vrot.lane.b32.xlu1 %v3018_v43, %s2786_s6  ;;  %316 = vrot.lane.b32.xlu0 %v2970_v19, %s2786_s6  ;;  %v3199_v1 = vrot.slane %v573_v27, %v3086_v10  ;;  %v1152_v19 = vcombine.low %v1087_v29, %v1103_v45 }
  0xd3   : > { %v3206_v34 = vrot.slane %v1152_v19, %v3086_v10 }
  0xd5   : > { %320 = vrot.lane.b32.xlu1 %v2979_v25, %s2786_s6  ;;  %324 = vrot.lane.b32.xlu0 %v2981_v26, %s2786_s6  ;;  %v1119_v25 = vrot.slane %v1105_v17, %v3033_v48  ;;  %v300_v17 = vrot.slane %v2977_v24, 2  ;;  %v1161_v24 = vcombine.high %v3089_v11, %v3070_v2 }
  0xd7   : > { %v1176_v26 = vcombine.low %v1119_v25, %v1135_v61  ;;  %v3257_v20 = vsel %vm293_vm4, %v300_v17, %v2991_v32 }
  0xd9   : > { %328 = vrot.lane.b32.xlu1 %v3020_v44, %s2786_s6  ;;  %436 = vrot.lane.b32.xlu0 %v2988_v31, %s2783_s4  ;;  %v3209_v44 = vrot.slane %v1176_v26, %v3086_v10 }
  0xdd   : > { %440 = vrot.lane.b32.xlu1 %v3092_v12, %s2783_s4  ;;  %444 = vrot.lane.b32.xlu0 %v2991_v32, %s2783_s4 }
  0xe1   : > { %448 = vrot.lane.b32.xlu1 %v3077_v5, %s2783_s4  ;;  %412 = vrot.lane.b32.xlu0 %v2975_v23, %s2783_s4 }
  0xe5   : > { %416 = vrot.lane.b32.xlu1 %v3006_v39, %s2783_s4  ;;  %420 = vrot.lane.b32.xlu0 %v2994_v33, %s2783_s4 }
  0xe9   : > { %424 = vrot.lane.b32.xlu1 %v3031_v47, %s2783_s4  ;;  %340 = vrot.lane.b32.xlu0 %v2975_v23, %s2786_s6  ;;  %v294_v23 = vrot.slane %v2960_v15, 2  ;;  %v303_v15 = vrot.slane %v3018_v43, 2 }
  0xed   : > { %344 = vrot.lane.b32.xlu1 %v3006_v39, %s2786_s6  ;;  %348 = vrot.lane.b32.xlu0 %v2994_v33, %s2786_s6  ;;  %v3245_v39 = vsel %vm293_vm4, %v294_v23, %v2988_v31  ;;  %v297_v33 = vrot.slane %v2962_v16, 2  ;;  %v3265_v16 = vsel %vm293_vm4, %v303_v15, %v3077_v5 }
  0xf1   : > { %352 = vrot.lane.b32.xlu1 %v3031_v47, %s2786_s6  ;;  %364 = vrot.lane.b32.xlu0 %v2988_v31, %s2786_s6  ;;  %v3254_v47 = vsel %vm293_vm4, %v297_v33, %v3092_v12  ;;  %v1185_v31 = vcombine.high %v3149_v57, %v3131_v37  ;;  %vm2512_vm4 = vcmask 1046534  }
  0xf2   : > { %v612_v46 = vcombine.low %v3254_v47, %v3265_v16 }
  0xf5   : > { %368 = vrot.lane.b32.xlu1 %v3092_v12, %s2786_s6  ;;  %372 = vrot.lane.b32.xlu0 %v2991_v32, %s2786_s6  ;;  %v1175_v32 = vrot.slane %v1161_v24, %v3086_v10 }
  0xf9   : > { %376 = vrot.lane.b32.xlu1 %v3077_v5, %s2786_s6  ;;  %434 = vrot.lane.b32.xlu0 %v3245_v39, %s2783_s4 }
  0xfd   : > { %438 = vrot.lane.b32.xlu1 %v3254_v47, %s2783_s4  ;;  %442 = vrot.lane.b32.xlu0 %v3257_v20, %s2783_s4 }
 0x101   : > { %446 = vrot.lane.b32.xlu1 %v3265_v16, %s2783_s4  ;;  %410 = vrot.lane.b32.xlu0 %v3010_v40, %s2783_s4 }
 0x105   : > { %414 = vrot.lane.b32.xlu1 %v3038_v52, %s2783_s4  ;;  %418 = vrot.lane.b32.xlu0 %v3014_v41, %s2783_s4 }
 0x109   : > { %422 = vrot.lane.b32.xlu1 %v3042_v53, %s2783_s4  ;;  %338 = vrot.lane.b32.xlu0 %v3010_v40, %s2786_s6  ;;  %v1151_v40 = vrot.slane %v1137_v4, %v3086_v10 }
 0x10b   : > { %v1187_v43 = vcombine.high %v1151_v40, %v1175_v32 }
 0x10d   : > { %342 = vrot.lane.b32.xlu1 %v3038_v52, %s2786_s6  ;;  %346 = vrot.lane.b32.xlu0 %v3014_v41, %s2786_s6  ;;  %v1186_v41 = vcombine.low %v1151_v40, %v1175_v32 }
 0x111   : > { %350 = vrot.lane.b32.xlu1 %v3042_v53, %s2786_s6  ;;  %362 = vrot.lane.b32.xlu0 %v3245_v39, %s2786_s6 }
 0x115   : > { %366 = vrot.lane.b32.xlu1 %v3254_v47, %s2786_s6  ;;  %370 = vrot.lane.b32.xlu0 %v3257_v20, %s2786_s6 }
 0x119   : > { %374 = vrot.lane.b32.xlu1 %v3265_v16, %s2786_s6  ;;  %1748 = vrot.lane.b32.xlu0 %v1185_v31, %s2787_s7 }
 0x11d   : > { %1768 = vrot.lane.b32.xlu0 %v1186_v41, %s2788_s8  ;;  %1608 = vrot.lane.b32.xlu1 %v589_v51, %s2787_s7  ;;  %v596_v51 = vcombine.low %v3245_v39, %v3257_v20 }
 0x11f   : > { %v3351_v22 = vrot.slane %v596_v51, %v3033_v48 }
 0x121   : > { %1788 = vrot.lane.b32.xlu0 %v1187_v43, %s2789_s17  ;;  %1628 = vrot.lane.b32.xlu1 %v590_v54, %s2788_s8 }
 0x125   : > { %1668 = vrot.lane.b32.xlu0 %v592_v62, %s2790_s19  ;;  %1648 = vrot.lane.b32.xlu1 %v591_v55, %s2789_s17  ;;  %v3348_v62 = vrot.slane %v612_v46, %v3033_v48 }
 0x127   : > { %v3325_v52 = vpop.permute.xlu0 %386  ;;  %v3327_v53 = vpop.permute.xlu1 %390  ;;  %v660_v19 = vcombine.low %v3351_v22, %v3348_v62 }
 0x129   : > { %1688 = vrot.lane.b32.xlu0 %v593_v63, %s2791_s20  ;;  %v3371_v24 = vrot.slane %v660_v19, %v3086_v10 }
 0x12b   : > { %4115 = vst [vmem:[#allocation10_spill] sm:$0xff] %v3371_v24 }
 0x12f   : > { %v3329_v59 = vpop.permute.xlu0 %394 }
 0x133   : > { %v3331_v60 = vpop.permute.xlu1 %398  ;;  %v3333_v2 = vpop.permute.xlu0 %388 }
 0x137   : > { %v3335_v4 = vpop.permute.xlu1 %392  ;;  %v3337_v5 = vpop.permute.xlu0 %396 }
 0x13b   : > { %v3339_v11 = vpop.permute.xlu1 %400  ;;  %v315_v12 = vpop.permute.xlu0 %314 }
 0x13f   : > { %v319_v28 = vpop.permute.xlu1 %318  ;;  %v323_v36 = vpop.permute.xlu0 %322 }
 0x140   : > { %v628_v54 = vcombine.low %v315_v12, %v323_v36  ;;  %v629_v6 = vcombine.high %v315_v12, %v323_v36 }
 0x142   : > { %v636_v27 = vrot.slane %v628_v54, %v3033_v48 }
 0x143   : > { %v327_v55 = vpop.permute.xlu1 %326  ;;  %v3345_v42 = vpop.permute.xlu0 %316 }
 0x144   : > { %v644_v63 = vcombine.low %v319_v28, %v327_v55  ;;  %v645_v9 = vcombine.high %v319_v28, %v327_v55  ;;  %v613_v55 = vcombine.high %v3254_v47, %v3265_v16 }
 0x146   : > { %v652_v29 = vrot.slane %v644_v63, %v3033_v48  ;;  %v3440_v16 = vrot.slane %v613_v55, %v3033_v48 }
 0x147   : > { %v3355_v45 = vpop.permute.xlu1 %320  ;;  %v3357_v25 = vpop.permute.xlu0 %324 }
 0x148   : > { %v692_v61 = vcombine.low %v636_v27, %v652_v29  ;;  %v1222_v26 = vcombine.low %v3345_v42, %v3357_v25  ;;  %v693_v36 = vcombine.high %v636_v27, %v652_v29 }
 0x14a   : > { %v3364_v23 = vrot.slane %v692_v61, %v3086_v10  ;;  %v3374_v31 = vrot.slane %v1222_v26, %v3033_v48  ;;  %v3392_v26 = vrot.slane %v1254_v56, %v3086_v10 }
 0x14b   : > { %v3366_v33 = vpop.permute.xlu1 %328  ;;  %v437_v17 = vpop.permute.xlu0 %436 }
 0x14c   : > { %4114 = vst [vmem:[#allocation9_spill] sm:$0xff] %v3364_v23  ;;  %v1238_v15 = vcombine.low %v3355_v45, %v3366_v33 }
 0x14e   : > { %v3377_v32 = vrot.slane %v1238_v15, %v3033_v48 }
 0x14f   : > { %v441_v41 = vpop.permute.xlu1 %440  ;;  %v445_v43 = vpop.permute.xlu0 %444 }
 0x150   : > { %v1278_v46 = vcombine.low %v3374_v31, %v3377_v32  ;;  %v1545_v51 = vcombine.high %v437_v17, %v445_v43  ;;  %v1544_v63 = vcombine.low %v437_v17, %v445_v43  ;;  %v1442_v43 = vcombine.low %v3335_v4, %v3339_v11 }
 0x152   : > { %v3384_v54 = vrot.slane %v1278_v46, %v3086_v10  ;;  %v1559_v38 = vrot.slane %v1545_v51, %v3033_v48  ;;  %v3404_v56 = vrot.slane %v1544_v63, %v3033_v48  ;;  %v597_v51 = vcombine.high %v3245_v39, %v3257_v20 }
 0x153   : > { %v449_v61 = vpop.permute.xlu1 %448  ;;  %v3386_v19 = vpop.permute.xlu0 %412  ;;  %v3430_v39 = vrot.slane %v629_v6, %v3033_v48  ;;  %v661_v6 = vcombine.high %v3351_v22, %v3348_v62  ;;  %v707_v22 = vrot.slane %v693_v36, %v3086_v10 }
 0x154   : > { %v1560_v15 = vcombine.low %v441_v41, %v449_v61  ;;  %v1561_v40 = vcombine.high %v441_v41, %v449_v61  ;;  %v3417_v61 = vrot.slane %v645_v9, %v3033_v48  ;;  %v3449_v29 = vrot.slane %v597_v51, %v3033_v48 }
 0x155   : > { %v1303_v62 = vcombine.high %v3392_v26, %v3384_v54  ;;  %v675_v36 = vrot.slane %v661_v6, %v3086_v10 }
 0x156   : > { %v3398_v46 = vrot.slane %v1560_v15, %v3033_v48  ;;  %v1575_v17 = vrot.slane %v1561_v40, %v3033_v48  ;;  %v1426_v40 = vcombine.low %v3333_v2, %v3337_v5 }
 0x157   : > { %v3406_v13 = vpop.permute.xlu1 %416  ;;  %v3408_v28 = vpop.permute.xlu0 %420  ;;  %v726_v6 = vcombine.low %v675_v36, %v707_v22 }
 0x158   : > { %v1592_v41 = vcombine.low %v1559_v38, %v1575_v17  ;;  %v1577_v12 = vcombine.high %v3404_v56, %v3398_v46  ;;  %v1458_v63 = vcombine.low %v3386_v19, %v3408_v28  ;;  %v3427_v38 = vrot.slane %v1442_v43, %v3033_v48 }
 0x159   : > { %v3452_v17 = vrot.slane %v1426_v40, %v3033_v48  ;;  %v708_v43 = vcombine.low %v3430_v39, %v3417_v61  ;;  %v1239_v40 = vcombine.high %v3355_v45, %v3366_v33  ;;  %v676_v45 = vcombine.low %v3449_v29, %v3440_v16 }
 0x15a   : > { %v3424_v15 = vrot.slane %v1592_v41, %v3086_v10  ;;  %v3437_v20 = vrot.slane %v1577_v12, %v3086_v10  ;;  %v3459_v55 = vrot.slane %v1458_v63, %v3033_v48  ;;  %v1279_v12 = vcombine.high %v3374_v31, %v3377_v32 }
 0x15b   : > { %v3432_v47 = vpop.permute.xlu1 %424  ;;  %v3434_v9 = vpop.permute.xlu0 %340  ;;  %v1490_v51 = vcombine.low %v3452_v17, %v3427_v38  ;;  %v1223_v33 = vcombine.high %v3345_v42, %v3357_v25  ;;  %v727_v31 = vcombine.high %v675_v36, %v707_v22  ;;  %v716_v32 = vrot.slane %v708_v43, %v3086_v10 }
 0x15c   : > { %v1474_v27 = vcombine.low %v3406_v13, %v3432_v47  ;;  %1816 = vrot.lane.b32.xlu0 %v3424_v15, %s2790_s19  ;;  %1776 = vrot.lane.b32.xlu1 %v3437_v20, %s2788_s8  ;;  %v1253_v21 = vrot.slane %v1239_v40, %v3033_v48  ;;  %v684_v42 = vrot.slane %v676_v45, %v3086_v10 }
 0x15d   : > { %v1237_v25 = vrot.slane %v1223_v33, %v3033_v48 }
 0x15e   : > { %v3462_v41 = vrot.slane %v1474_v27, %v3033_v48  ;;  %v725_v27 = vcombine.high %v3371_v24, %v3364_v23  ;;  %v1293_v23 = vrot.slane %v1279_v12, %v3086_v10  ;;  %v3499_v24 = vrot.slane %v1490_v51, %v3086_v10 }
 0x15f   : > { %v3473_v14 = vpop.permute.xlu1 %344  ;;  %v3475_v63 = vpop.permute.xlu0 %348  ;;  %v1576_v51 = vcombine.low %v3404_v56, %v3398_v46  ;;  %v728_v40 = vcombine.low %v684_v42, %v716_v32  ;;  %v1294_v12 = vcombine.low %v1237_v25, %v1253_v21  ;;  %v729_v46 = vcombine.high %v684_v42, %v716_v32 }
 0x160   : > { %v1514_v7 = vcombine.low %v3459_v55, %v3462_v41  ;;  %1750 = vrot.lane.b32.xlu0 %v1303_v62, %s2787_s7  ;;  %1610 = vrot.lane.b32.xlu1 %v725_v27, %s2787_s7  ;;  %4117 = vst [vmem:[#allocation12_spill] sm:$0xff] %v3499_v24  ;;  %v709_v56 = vcombine.high %v3430_v39, %v3417_v61 }
 0x161   : > { %v3526_v21 = vrot.slane %v1576_v51, %v3086_v10  ;;  %v4119_v61 = vcombine.low %v3168_v3, %v3171_v8  ;;  %v677_v42 = vcombine.high %v3449_v29, %v3440_v16 }
 0x162   : > { %v3490_v0 = vrot.slane %v1514_v7, %v3086_v10  ;;  %v4118_v7 = vcombine.high %v3125_v49, %v3128_v50  ;;  %v1308_v49 = vcombine.low %v3434_v9, %v3475_v63  ;;  %v723_v16 = vrot.slane %v709_v56, %v3086_v10 }
 0x163   : > { %v3493_v58 = vpop.permute.xlu1 %352  ;;  %v3495_v62 = vpop.permute.xlu0 %364  ;;  %v1277_v39 = vrot.slane %v4119_v61, %v3086_v10 }
 0x164   : > { %4116 = vst [vmem:[#allocation11_spill] sm:$0xff] %v3490_v0  ;;  %1650 = vrot.lane.b32.xlu0 %v727_v31, %s2789_s17  ;;  %1630 = vrot.lane.b32.xlu1 %v726_v6, %s2788_s8  ;;  %v1269_v43 = vrot.slane %v4118_v7, %v3086_v10  ;;  %v1324_v27 = vcombine.low %v3473_v14, %v3493_v58 }
 0x165   : > { %v3539_v32 = vrot.slane %v1308_v49, %v3033_v48 }
 0x166   : > { %v1304_v33 = vcombine.low %v1269_v43, %v1293_v23  ;;  %v3531_v31 = vrot.slane %v1324_v27, %v3033_v48  ;;  %v1305_v7 = vcombine.high %v1269_v43, %v1293_v23  ;;  %v1475_v23 = vcombine.high %v3406_v13, %v3432_v47 }
 0x167   : > { %v3515_v36 = vpop.permute.xlu1 %368  ;;  %v3517_v45 = vpop.permute.xlu0 %372  ;;  %v1443_v13 = vcombine.high %v3335_v4, %v3339_v11  ;;  %v1459_v47 = vcombine.high %v3386_v19, %v3408_v28  ;;  %v1539_v4 = vcombine.high %v3499_v24, %v3490_v0 }
 0x168   : > { %1670 = vrot.lane.b32.xlu0 %v728_v40, %s2790_s19  ;;  %1770 = vrot.lane.b32.xlu1 %v1304_v33, %s2788_s8  ;;  %v1340_v50 = vcombine.low %v3495_v62, %v3517_v45  ;;  %v1301_v40 = vrot.slane %v1294_v12, %v3086_v10  ;;  %v4120_v12 = vmov 0.0   ;;  %v1372_v49 = vcombine.low %v3539_v32, %v3531_v31 }
 0x169   : > { %v1600_v27 = vcombine.high %v3526_v21, %v4120_v12  ;;  %v1489_v56 = vrot.slane %v1475_v23, %v3033_v48 }
 0x16a   : > { %v3551_v43 = vrot.slane %v1340_v50, %v3033_v48  ;;  %v691_v50 = vrot.slane %v677_v42, %v3086_v10  ;;  %v3581_v61 = vrot.slane %v1372_v49, %v3086_v10  ;;  %v1457_v42 = vrot.slane %v1443_v13, %v3033_v48 }
 0x16b   : > { %v377_v6 = vpop.permute.xlu1 %376  ;;  %v3533_v25 = vpop.permute.xlu0 %434  ;;  %v1307_v23 = vcombine.high %v1277_v39, %v1301_v40 }
 0x16c   : > { %v1356_v33 = vcombine.low %v3515_v36, %v377_v6  ;;  %1690 = vrot.lane.b32.xlu0 %v729_v46, %s2791_s20  ;;  %1790 = vrot.lane.b32.xlu1 %v1305_v7, %s2789_s17  ;;  %v1306_v46 = vcombine.low %v1277_v39, %v1301_v40  ;;  %v1427_v7 = vcombine.high %v3333_v2, %v3337_v5 }
 0x16d   : > { %v1357_v49 = vcombine.high %v3515_v36, %v377_v6  ;;  %v1341_v36 = vcombine.high %v3495_v62, %v3517_v45  ;;  %v868_v6 = vcombine.low %v3325_v52, %v3329_v59 }
 0x16e   : > { %v3554_v51 = vrot.slane %v1356_v33, %v3033_v48  ;;  %v730_v33 = vcombine.low %v691_v50, %v723_v16 }
 0x16f   : > { %v439_v3 = vpop.permute.xlu1 %438  ;;  %v443_v8 = vpop.permute.xlu0 %442  ;;  %v1371_v40 = vrot.slane %v1357_v49, %v3033_v48 }
 0x170   : > { %v1396_v29 = vcombine.low %v3551_v43, %v3554_v51  ;;  %1756 = vrot.lane.b32.xlu0 %v1600_v27, %s2787_s7  ;;  %1810 = vrot.lane.b32.xlu1 %v1306_v46, %s2790_s19  ;;  %v1473_v27 = vrot.slane %v1459_v47, %v3033_v48  ;;  %v1004_v5 = vcombine.low %v3533_v25, %v443_v8 }
 0x171   : > { %v1441_v46 = vrot.slane %v1427_v7, %v3033_v48  ;;  %v884_v47 = vcombine.low %v3327_v53, %v3331_v60  ;;  %v1325_v7 = vcombine.high %v3473_v14, %v3493_v58  ;;  %v1602_v14 = vcombine.high %v3424_v15, %v4120_v12 }
 0x172   : > { %v3576_v11 = vrot.slane %v1396_v29, %v3086_v10  ;;  %v1530_v29 = vcombine.low %v1473_v27, %v1489_v56  ;;  %v1005_v56 = vcombine.high %v3533_v25, %v443_v8  ;;  %v731_v8 = vcombine.high %v691_v50, %v723_v16 }
 0x173   : > { %v447_v19 = vpop.permute.xlu1 %446  ;;  %v3578_v28 = vpop.permute.xlu0 %410  ;;  %v1506_v24 = vcombine.low %v1441_v46, %v1457_v42  ;;  %v3622_v45 = vrot.slane %v884_v47, %v3033_v48  ;;  %v1339_v42 = vrot.slane %v1325_v7, %v3033_v48  ;;  %v1355_v27 = vrot.slane %v1341_v36, %v3033_v48 }
 0x174   : > { %v1020_v2 = vcombine.low %v439_v3, %v447_v19  ;;  %1754 = vrot.lane.b32.xlu0 %v1539_v4, %s2787_s7  ;;  %1710 = vrot.lane.b32.xlu1 %v730_v33, %s2792_s22  ;;  %v1421_v13 = vcombine.high %v3581_v61, %v3576_v11  ;;  %v1021_v4 = vcombine.high %v439_v3, %v447_v19 }
 0x175   : > { %v1309_v3 = vcombine.high %v3434_v9, %v3475_v63  ;;  %v1012_v19 = vrot.slane %v1004_v5, %v3033_v48  ;;  %v1537_v62 = vrot.slane %v1530_v29, %v3086_v10  ;;  %v3637_v5 = vrot.slane %v868_v6, %v3033_v48 }
 0x176   : > { %v3597_v22 = vrot.slane %v1020_v2, %v3033_v48  ;;  %v1035_v9 = vrot.slane %v1021_v4, %v3033_v48  ;;  %v1513_v2 = vrot.slane %v1506_v24, %v3086_v10  ;;  %v1019_v46 = vrot.slane %v1005_v56, %v3033_v48 }
 0x177   : > { %v3599_v0 = vpop.permute.xlu1 %414  ;;  %v3601_v33 = vpop.permute.xlu0 %418  ;;  %v1412_v16 = vcombine.low %v1355_v27, %v1371_v40  ;;  %v932_v7 = vcombine.low %v3637_v5, %v3622_v45 }
 0x178   : > { %1752 = vrot.lane.b32.xlu0 %v1421_v13, %s2787_s7  ;;  %1830 = vrot.lane.b32.xlu1 %v1307_v23, %s2791_s20  ;;  %v900_v58 = vcombine.low %v3578_v28, %v3601_v33  ;;  %v1037_v63 = vcombine.high %v1012_v19, %v3597_v22  ;;  %v1323_v23 = vrot.slane %v1309_v3, %v3033_v48 }
 0x179   : > { %v1542_v49 = vcombine.low %v1513_v2, %v1537_v62  ;;  %v1052_v13 = vcombine.low %v1019_v46, %v1035_v9  ;;  %v1543_v3 = vcombine.high %v1513_v2, %v1537_v62  ;;  %v1419_v56 = vrot.slane %v1412_v16, %v3086_v10 }
 0x17a   : > { %v3643_v50 = vrot.slane %v900_v58, %v3033_v48  ;;  %v3653_v4 = vrot.slane %v1037_v63, %v3086_v10  ;;  %v1388_v36 = vcombine.low %v1323_v23, %v1339_v42  ;;  %v1053_v58 = vcombine.high %v1019_v46, %v1035_v9 }
 0x17b   : > { %v3626_v25 = vpop.permute.xlu1 %422  ;;  %v3628_v39 = vpop.permute.xlu0 %338  ;;  %v3676_v27 = vrot.slane %v932_v7, %v3086_v10  ;;  %v1036_v62 = vcombine.low %v1012_v19, %v3597_v22  ;;  %v1515_v2 = vcombine.high %v3459_v55, %v3462_v41  ;;  %v1491_v19 = vcombine.high %v3452_v17, %v3427_v38 }
 0x17c   : > { %v916_v15 = vcombine.low %v3599_v0, %v3626_v25  ;;  %1836 = vrot.lane.b32.xlu0 %v1602_v14, %s2791_s20  ;;  %1730 = vrot.lane.b32.xlu1 %v731_v8, %s2793_s26  ;;  %v3671_v8 = vrot.slane %v1052_v13, %v3086_v10  ;;  %v1395_v42 = vrot.slane %v1388_v36, %v3086_v10 }
 0x17d   : > { %v3690_v16 = vrot.slane %v1053_v58, %v3086_v10  ;;  %v3700_v55 = vrot.slane %v1036_v62, %v3086_v10  ;;  %v1601_v38 = vcombine.high %v3437_v20, %v4120_v12  ;;  %v1529_v17 = vrot.slane %v1515_v2, %v3086_v10 }
 0x17e   : > { %v3646_v29 = vrot.slane %v916_v15, %v3033_v48  ;;  %v1424_v9 = vcombine.low %v1395_v42, %v1419_v56  ;;  %v1425_v13 = vcombine.high %v1395_v42, %v1419_v56  ;;  %v4121_v58 = vcombine.low %v3149_v57, %v3131_v37 }
 0x17f   : > { %v3648_v24 = vpop.permute.xlu1 %342  ;;  %v3650_v47 = vpop.permute.xlu0 %346  ;;  %v1068_v20 = vcombine.high %v3700_v55, %v4120_v12  ;;  %v1505_v56 = vrot.slane %v1491_v19, %v3086_v10  ;;  %v933_v2 = vcombine.high %v3637_v5, %v3622_v45  ;;  %v4122_v45 = vcombine.low %v3116_v35, %v3099_v18 }
 0x180   : > { %v964_v6 = vcombine.low %v3643_v50, %v3646_v29  ;;  %1814 = vrot.lane.b32.xlu0 %v1542_v49, %s2790_s19  ;;  %1636 = vrot.lane.b32.xlu1 %v3653_v4, %s2788_s8  ;;  %v732_v41 = vcombine.low %v3628_v39, %v3650_v47  ;;  %v965_v42 = vcombine.high %v3643_v50, %v3646_v29 }
 0x182   : > { %v3664_v40 = vrot.slane %v964_v6, %v3086_v10 }
 0x183   : > { %v3666_v14 = vpop.permute.xlu1 %350  ;;  %v3668_v63 = vpop.permute.xlu0 %362 }
 0x184   : > { %1834 = vrot.lane.b32.xlu0 %v1543_v3, %s2791_s20  ;;  %1676 = vrot.lane.b32.xlu1 %v3671_v8, %s2790_s19  ;;  %v996_v15 = vcombine.low %v3676_v27, %v3664_v40  ;;  %v748_v22 = vcombine.low %v3648_v24, %v3666_v14 }
 0x186   : > { %v3712_v6 = vrot.slane %v748_v22, %v3033_v48  ;;  %v1397_v22 = vcombine.high %v3551_v43, %v3554_v51  ;;  %v917_v51 = vcombine.high %v3599_v0, %v3626_v25  ;;  %v901_v0 = vcombine.high %v3578_v28, %v3601_v33 }
 0x187   : > { %v3685_v23 = vpop.permute.xlu1 %366  ;;  %v3687_v46 = vpop.permute.xlu0 %370 }
 0x188   : > { %1812 = vrot.lane.b32.xlu0 %v1424_v9, %s2790_s19  ;;  %1716 = vrot.lane.b32.xlu1 %v3690_v16, %s2792_s22  ;;  %v764_v49 = vcombine.low %v3668_v63, %v3687_v46  ;;  %v3728_v9 = vrot.slane %v732_v41, %v3033_v48  ;;  %v1373_v41 = vcombine.high %v3539_v32, %v3531_v31 }
 0x189   : > { %v979_v31 = vrot.slane %v965_v42, %v3086_v10  ;;  %v885_v32 = vcombine.high %v3327_v53, %v3331_v60  ;;  %v869_v60 = vcombine.high %v3325_v52, %v3329_v59  ;;  %v931_v28 = vrot.slane %v917_v51, %v3033_v48 }
 0x18a   : > { %v3731_v37 = vrot.slane %v764_v49, %v3033_v48  ;;  %v796_v50 = vcombine.low %v3728_v9, %v3712_v6  ;;  %v1387_v53 = vrot.slane %v1373_v41, %v3086_v10  ;;  %v1070_v51 = vcombine.high %v3671_v8, %v4120_v12 }
 0x18b   : > { %v3706_v7 = vpop.permute.xlu1 %374  ;;  %v1749_v36 = vpop.permute.xlu0 %1748  ;;  %v883_v59 = vrot.slane %v869_v60, %v3033_v48 }
 0x18c   : > { %v780_v3 = vcombine.low %v3685_v23, %v3706_v7  ;;  %v1885_v62 = vsel %vm1843_vm5, %v4121_v58, %v1749_v36  ;;  %1832 = vrot.lane.b32.xlu0 %v1425_v13, %s2791_s20  ;;  %1796 = vrot.lane.b32.xlu1 %v1601_v38, %s2789_s17  ;;  %v1540_v36 = vcombine.low %v1505_v56, %v1529_v17 }
 0x18d   : > { %v1069_v38 = vcombine.high %v3653_v4, %v4120_v12  ;;  %v947_v58 = vrot.slane %v933_v2, %v3086_v10  ;;  %v3768_v25 = vrot.slane %v796_v50, %v3086_v10 }
 0x18e   : > { %v3734_v57 = vrot.slane %v780_v3, %v3033_v48  ;;  %v1541_v3 = vcombine.high %v1505_v56, %v1529_v17 }
 0x18f   : > { %v1769_v13 = vpop.permute.xlu0 %1768  ;;  %v1609_v19 = vpop.permute.xlu1 %1608  ;;  %v998_v33 = vcombine.low %v947_v58, %v979_v31 }
 0x190   : > { %v828_v29 = vcombine.low %v3731_v37, %v3734_v57  ;;  %1616 = vrot.lane.b32.xlu0 %v1068_v20, %s2787_s7  ;;  %v1890_v49 = vsel %vm1849_vm6, %v1885_v62, %v1769_v13  ;;  %v1844_v43 = vsel %vm1843_vm5, %v4122_v45, %v1609_v19  ;;  %1774 = vrot.lane.b32.xlu1 %v1540_v36, %s2788_s8 }
 0x191   : > { %v1411_v62 = vrot.slane %v1397_v22, %v3086_v10  ;;  %v899_v22 = vrot.slane %v885_v32, %v3033_v48  ;;  %v915_v13 = vrot.slane %v901_v0, %v3033_v48  ;;  %v829_v32 = vcombine.high %v3731_v37, %v3734_v57 }
 0x192   : > { %v3756_v5 = vrot.slane %v828_v29, %v3086_v10 }
 0x193   : > { %v1789_v18 = vpop.permute.xlu0 %1788  ;;  %v1629_v35 = vpop.permute.xlu1 %1628  ;;  %v1422_v2 = vcombine.low %v1387_v53, %v1411_v62  ;;  %v980_v36 = vcombine.low %v915_v13, %v931_v28  ;;  %v1423_v41 = vcombine.high %v1387_v53, %v1411_v62  ;;  %v765_v62 = vcombine.high %v3668_v63, %v3687_v46 }
 0x194   : > { %v3771_v4 = vsel %vm1855_vm7, %v1890_v49, %v1789_v18  ;;  %v1850_v20 = vsel %vm1849_vm6, %v1844_v43, %v1629_v35  ;;  %1656 = vrot.lane.b32.xlu0 %v1069_v38, %s2789_s17  ;;  %1794 = vrot.lane.b32.xlu1 %v1541_v3, %s2789_s17  ;;  %v860_v17 = vcombine.low %v3768_v25, %v3756_v5 }
 0x195   : > { %v861_v50 = vcombine.high %v3768_v25, %v3756_v5  ;;  %v948_v49 = vcombine.low %v883_v59, %v899_v22  ;;  %v988_v43 = vrot.slane %v980_v36, %v3086_v10  ;;  %v781_v38 = vcombine.high %v3685_v23, %v3706_v7 }
 0x196   : > { %v997_v18 = vcombine.high %v3676_v27, %v3664_v40  ;;  %v749_v35 = vcombine.high %v3648_v24, %v3666_v14  ;;  %v797_v3 = vcombine.high %v3728_v9, %v3712_v6  ;;  %v733_v23 = vcombine.high %v3628_v39, %v3650_v47 }
 0x197   : > { %v1669_v56 = vpop.permute.xlu0 %1668  ;;  %v1649_v42 = vpop.permute.xlu1 %1648  ;;  %v956_v8 = vrot.slane %v948_v49, %v3086_v10  ;;  %v795_v7 = vrot.slane %v781_v38, %v3033_v48  ;;  %v843_v37 = vrot.slane %v829_v32, %v3086_v10  ;;  %v999_v14 = vcombine.high %v947_v58, %v979_v31 }
 0x198   : > { %v1856_v19 = vsel %vm1855_vm7, %v1850_v20, %v1649_v42  ;;  %1634 = vrot.lane.b32.xlu0 %v998_v33, %s2788_s8  ;;  %1772 = vrot.lane.b32.xlu1 %v1422_v2, %s2788_s8  ;;  %v763_v6 = vrot.slane %v749_v35, %v3033_v48  ;;  %v811_v9 = vrot.slane %v797_v3, %v3086_v10 }
 0x199   : > { %v1862_v52 = vsel %vm1861_vm8, %v1856_v19, %v1669_v56  ;;  %v1000_v24 = vcombine.low %v956_v8, %v988_v43  ;;  %v779_v63 = vrot.slane %v765_v62, %v3033_v48  ;;  %v747_v46 = vrot.slane %v733_v23, %v3033_v48 }
 0x19a   : > { %v863_v39 = vcombine.high %v811_v9, %v843_v37  ;;  %v981_v47 = vcombine.high %v915_v13, %v931_v28  ;;  %v862_v0 = vcombine.low %v811_v9, %v843_v37  ;;  %v949_v31 = vcombine.high %v883_v59, %v899_v22 }
 0x19b   : > { %v1689_v29 = vpop.permute.xlu0 %1688  ;;  %v844_v57 = vcombine.low %v779_v63, %v795_v7  ;;  %v812_v20 = vcombine.low %v747_v46, %v763_v6  ;;  %v1071_v58 = vcombine.high %v3690_v16, %v4120_v12  ;;  %v1001_v33 = vcombine.high %v956_v8, %v988_v43 }
 0x19c   : > { %v3792_v45 = vsel %vm1867_vm9, %v1862_v52, %v1689_v29  ;;  %1612 = vrot.lane.b32.xlu0 %v861_v50, %s2787_s7  ;;  %1792 = vrot.lane.b32.xlu1 %v1423_v41, %s2789_s17  ;;  %v995_v60 = vrot.slane %v981_v47, %v3086_v10  ;;  %v963_v28 = vrot.slane %v949_v31, %v3086_v10 }
 0x19d   : > { %v852_v53 = vrot.slane %v844_v57, %v3086_v10  ;;  %v820_v56 = vrot.slane %v812_v20, %v3086_v10  ;;  %v845_v22 = vcombine.high %v779_v63, %v795_v7  ;;  %v813_v19 = vcombine.high %v747_v46, %v763_v6  ;;  %v4128_v57 = vld [vmem:[#allocation10_spill] sm:$0xff] }
 0x19e   : > { %v1002_v2 = vcombine.low %v963_v28, %v995_v60  ;;  %v1003_v16 = vcombine.high %v963_v28, %v995_v60  ;;  %v4123_v59 = vcombine.low %v3206_v34, %v3209_v44  ;;  %v4124_v50 = vcombine.low %v3196_v30, %v3199_v1 }
 0x19f   : > { %v864_v42 = vcombine.low %v820_v56, %v852_v53  ;;  %v865_v13 = vcombine.high %v820_v56, %v852_v53  ;;  %v859_v52 = vrot.slane %v845_v22, %v3086_v10  ;;  %v827_v36 = vrot.slane %v813_v19, %v3086_v10 }
 0x1a0   : > { %1696 = vrot.lane.b32.xlu0 %v1070_v51, %s2791_s20  ;;  %1614 = vrot.lane.b32.xlu1 %v997_v18, %s2787_s7  ;;  %v1910_v29 = vcombine.low %v4120_v12, %v4120_v12  ;;  %v1911_v41 = vcombine.high %v4120_v12, %v4120_v12  ;;  %v4125_v43 = vcombine.high %v3206_v34, %v3209_v44 }
 0x1a1   : > { %v866_v49 = vcombine.low %v827_v36, %v859_v52  ;;  %v867_v35 = vcombine.high %v827_v36, %v859_v52  ;;  %v4126_v7 = vcombine.high %v3196_v30, %v3199_v1  ;;  %v4127_v1 = vcombine.low %v3392_v26, %v3384_v54 }
 0x1a2   : > { %v1918_v51 = vrot.slane %v1910_v29, %v3033_v48  ;;  %v1925_v38 = vrot.slane %v1911_v41, %v3033_v48 }
 0x1a4   : > { %1674 = vrot.lane.b32.xlu0 %v1000_v24, %s2790_s19  ;;  %1654 = vrot.lane.b32.xlu1 %v999_v14, %s2789_s17  ;;  %v1926_v32 = vcombine.low %v1918_v51, %v1918_v51  ;;  %v1927_v18 = vcombine.high %v1918_v51, %v1918_v51  ;;  %v1942_v8 = vcombine.low %v1925_v38, %v1925_v38 }
 0x1a6   : > { %v3860_v3 = vrot.slane %v1926_v32, %v3086_v10  ;;  %v1941_v62 = vrot.slane %v1927_v18, %v3086_v10  ;;  %v1949_v23 = vrot.slane %v1942_v8, %v3086_v10 }
 0x1a8   : > { %1652 = vrot.lane.b32.xlu0 %v863_v39, %s2789_s17  ;;  %1632 = vrot.lane.b32.xlu1 %v862_v0, %s2788_s8  ;;  %v1951_v34 = vcombine.high %v3860_v3, %v3860_v3  ;;  %v1953_v44 = vcombine.high %v1941_v62, %v1941_v62  ;;  %v1952_v37 = vcombine.low %v1941_v62, %v1941_v62  ;;  %v4129_v39 = vld [vmem:[#allocation9_spill] sm:$0xff] }
 0x1a9   : > { %v1955_v24 = vcombine.high %v1949_v23, %v1949_v23  ;;  %v1954_v14 = vcombine.low %v1949_v23, %v1949_v23  ;;  %v4130_v47 = vcombine.low %v4128_v57, %v4129_v39 }
 0x1ac   : > { %1736 = vrot.lane.b32.xlu0 %v1071_v58, %s2793_s26  ;;  %1694 = vrot.lane.b32.xlu1 %v1001_v33, %s2791_s20 }
 0x1b0   : > { %1672 = vrot.lane.b32.xlu0 %v864_v42, %s2790_s19  ;;  %1714 = vrot.lane.b32.xlu1 %v1002_v2, %s2792_s22 }
 0x1b4   : > { %1734 = vrot.lane.b32.xlu0 %v1003_v16, %s2793_s26  ;;  %1692 = vrot.lane.b32.xlu1 %v865_v13, %s2791_s20 }
 0x1b8   : > { %1808 = vrot.lane.b32.xlu0 %v4123_v59, %s2790_s19  ;;  %1708 = vrot.lane.b32.xlu1 %v4124_v50, %s2792_s22 }
 0x1bc   : > { %1828 = vrot.lane.b32.xlu0 %v4125_v43, %s2791_s20  ;;  %1712 = vrot.lane.b32.xlu1 %v866_v49, %s2792_s22 }
 0x1c0   : > { %1732 = vrot.lane.b32.xlu1 %v867_v35, %s2793_s26  ;;  %1957 = vrot.lane.b32.xlu0 %v1951_v34, %s2787_s7 }
 0x1c4   : > { %1728 = vrot.lane.b32.xlu1 %v4126_v7, %s2793_s26  ;;  %1965 = vrot.lane.b32.xlu0 %v1953_v44, %s2789_s17 }
 0x1c8   : > { %1961 = vrot.lane.b32.xlu1 %v1952_v37, %s2788_s8  ;;  %1973 = vrot.lane.b32.xlu0 %v1955_v24, %s2791_s20 }
 0x1cc   : > { %1969 = vrot.lane.b32.xlu1 %v1954_v14, %s2790_s19  ;;  %1980 = vrot.lane.b32.xlu0 %v4120_v12, %s2793_s26 }
 0x1ce   : > { %v1817_v6 = vpop.permute.xlu0 %1816  ;;  %v1777_v9 = vpop.permute.xlu1 %1776 }
 0x1d0   : > { %1977 = vrot.lane.b32.xlu1 %v4120_v12, %s2792_s22 }
 0x1d2   : > { %v1751_v30 = vpop.permute.xlu0 %1750  ;;  %v1611_v46 = vpop.permute.xlu1 %1610 }
 0x1d3   : > { %v1886_v63 = vsel %vm1843_vm5, %v4127_v1, %v1751_v30  ;;  %v1845_v0 = vsel %vm1843_vm5, %v4130_v47, %v1611_v46 }
 0x1d6   : > { %v1651_v20 = vpop.permute.xlu0 %1650  ;;  %v1631_v31 = vpop.permute.xlu1 %1630 }
 0x1d7   : > { %v1851_v58 = vsel %vm1849_vm6, %v1845_v0, %v1631_v31 }
 0x1d8   : > { %v1857_v53 = vsel %vm1855_vm7, %v1851_v58, %v1651_v20 }
 0x1da   : > { %v1671_v60 = vpop.permute.xlu0 %1670  ;;  %v1771_v56 = vpop.permute.xlu1 %1770 }
 0x1db   : > { %v1863_v33 = vsel %vm1861_vm8, %v1857_v53, %v1671_v60  ;;  %v1891_v54 = vsel %vm1849_vm6, %v1886_v63, %v1771_v56  ;;  %v4131_v53 = vld [vmem:[#allocation12_spill] sm:$0xff]  ;;  %v4132_v60 = vld [vmem:[#allocation11_spill] sm:$0xff] }
 0x1de   : > { %v1691_v26 = vpop.permute.xlu0 %1690  ;;  %v1791_v42 = vpop.permute.xlu1 %1790 }
 0x1df   : > { %v1869_v28 = vsel %vm1867_vm9, %v1863_v33, %v1691_v26  ;;  %v1896_v2 = vsel %vm1855_vm7, %v1891_v54, %v1791_v42  ;;  %v4133_v33 = vcombine.low %v4131_v53, %v4132_v60 }
 0x1e2   : > { %v1757_v16 = vpop.permute.xlu0 %1756  ;;  %v1811_v22 = vpop.permute.xlu1 %1810 }
 0x1e3   : > { %v1901_v13 = vsel %vm1861_vm8, %v1896_v2, %v1811_v22  ;;  %v1889_v8 = vsel %vm1843_vm5, %v3526_v21, %v1757_v16 }
 0x1e4   : > { %v1894_v44 = vsel %vm1849_vm6, %v1889_v8, %v1777_v9 }
 0x1e6   : > { %v1755_v19 = vpop.permute.xlu0 %1754  ;;  %v1711_v52 = vpop.permute.xlu1 %1710 }
 0x1e7   : > { %v1875_v59 = vsel %vm1873_vm10, %v1869_v28, %v1711_v52  ;;  %v1888_v56 = vsel %vm1843_vm5, %v4133_v33, %v1755_v19 }
 0x1ea   : > { %v1753_v36 = vpop.permute.xlu0 %1752  ;;  %v1831_v50 = vpop.permute.xlu1 %1830 }
 0x1eb   : > { %v3897_v29 = vsel %vm1867_vm9, %v1901_v13, %v1831_v50  ;;  %v4134_v50 = vcombine.low %v3581_v61, %v3576_v11 }
 0x1ee   : > { %v1837_v41 = vpop.permute.xlu0 %1836  ;;  %v1731_v49 = vpop.permute.xlu1 %1730 }
 0x1ef   : > { %v3900_v43 = vsel %vm1879_vm11, %v1875_v59, %v1731_v49 }
 0x1f2   : > { %v1815_v51 = vpop.permute.xlu0 %1814  ;;  %v1637_v38 = vpop.permute.xlu1 %1636 }
 0x1f6   : > { %v1835_v32 = vpop.permute.xlu0 %1834  ;;  %v1677_v18 = vpop.permute.xlu1 %1676 }
 0x1fa   : > { %v1813_v35 = vpop.permute.xlu0 %1812  ;;  %v1717_v62 = vpop.permute.xlu1 %1716 }
 0x1fe   : > { %v1833_v34 = vpop.permute.xlu0 %1832  ;;  %v1797_v23 = vpop.permute.xlu1 %1796 }
 0x1ff   : > { %v1899_v7 = vsel %vm1855_vm7, %v1894_v44, %v1797_v23 }
 0x200   : > { %v1904_v37 = vsel %vm1861_vm8, %v1899_v7, %v1817_v6 }
 0x201   : > { %v1909_v14 = vsel %vm1867_vm9, %v1904_v37, %v1837_v41  ;;  %v1887_v41 = vsel %vm1843_vm5, %v4134_v50, %v1753_v36 }
 0x202   : > { %v1617_v24 = vpop.permute.xlu0 %1616  ;;  %2612 = vmatprep.subr.msk.mxu0 %vm1994_vm12, %v1909_v14  ;;  %v1775_v30 = vpop.permute.xlu1 %1774 }
 0x203   : > { %v1848_v9 = vsel %vm1843_vm5, %v3700_v55, %v1617_v24  ;;  %v1893_v54 = vsel %vm1849_vm6, %v1888_v56, %v1775_v30 }
 0x204   : > { %v1854_v20 = vsel %vm1849_vm6, %v1848_v9, %v1637_v38 }
 0x206   : > { %v1657_v1 = vpop.permute.xlu0 %1656  ;;  %v1795_v63 = vpop.permute.xlu1 %1794 }
 0x207   : > { %v1860_v31 = vsel %vm1855_vm7, %v1854_v20, %v1657_v1  ;;  %v1898_v26 = vsel %vm1855_vm7, %v1893_v54, %v1795_v63 }
 0x208   : > { %v1866_v28 = vsel %vm1861_vm8, %v1860_v31, %v1677_v18  ;;  %v1903_v22 = vsel %vm1861_vm8, %v1898_v26, %v1815_v51 }
 0x209   : > { %v1908_v40 = vsel %vm1867_vm9, %v1903_v22, %v1835_v32 }
 0x20a   : > { %v1635_v46 = vpop.permute.xlu0 %1634  ;;  %v1773_v57 = vpop.permute.xlu1 %1772 }
 0x20b   : > { %v1892_v27 = vsel %vm1849_vm6, %v1887_v41, %v1773_v57 }
 0x20e   : > { %v1613_v21 = vpop.permute.xlu0 %1612  ;;  %v1793_v39 = vpop.permute.xlu1 %1792 }
 0x20f   : > { %v1897_v51 = vsel %vm1855_vm7, %v1892_v27, %v1793_v39  ;;  %v1846_v37 = vsel %vm1843_vm5, %v860_v17, %v1613_v21 }
 0x210   : > { %v1902_v61 = vsel %vm1861_vm8, %v1897_v51, %v1813_v35 }
 0x211   : > { %v1907_v23 = vsel %vm1867_vm9, %v1902_v61, %v1833_v34 }
 0x212   : > { %v1697_v47 = vpop.permute.xlu0 %1696  ;;  %v1615_v0 = vpop.permute.xlu1 %1614 }
 0x213   : > { %v1872_v55 = vsel %vm1867_vm9, %v1866_v28, %v1697_v47  ;;  %v1847_v16 = vsel %vm1843_vm5, %v996_v15, %v1615_v0  ;;  %v458_v47 = vld [vmem:[%s4097_s1] sm:$0xff] }
 0x214   : > { %v1878_v19 = vsel %vm1873_vm10, %v1872_v55, %v1717_v62  ;;  %v1853_v49 = vsel %vm1849_vm6, %v1847_v16, %v1635_v46  ;;  %v459_v16 = vld [vmem:[%s4098_s2] sm:$0xff] }
 0x216   : > { %v1675_v6 = vpop.permute.xlu0 %1674  ;;  %v1655_v58 = vpop.permute.xlu1 %1654 }
 0x217   : > { %v1859_v15 = vsel %vm1855_vm7, %v1853_v49, %v1655_v58 }
 0x218   : > { %v1865_v62 = vsel %vm1861_vm8, %v1859_v15, %v1675_v6 }
 0x21a   : > { %v1653_v42 = vpop.permute.xlu0 %1652  ;;  %v1633_v2 = vpop.permute.xlu1 %1632 }
 0x21b   : > { %v1852_v24 = vsel %vm1849_vm6, %v1846_v37, %v1633_v2 }
 0x21c   : > { %v1858_v30 = vsel %vm1855_vm7, %v1852_v24, %v1653_v42 }
 0x21e   : > { %v1737_v13 = vpop.permute.xlu0 %1736  ;;  %v1695_v52 = vpop.permute.xlu1 %1694 }
 0x21f   : > { %v1884_v59 = vsel %vm1879_vm11, %v1878_v19, %v1737_v13  ;;  %v1871_v11 = vsel %vm1867_vm9, %v1865_v62, %v1695_v52 }
 0x220   : > { %2613 = vmatpush1.msk.msra.mxu0 %vm1994_vm12, %v1884_v59 }
 0x221   : > { %2025 = vmatprep.subr.mxu0 %v1908_v40 }
 0x222   : > { %v1673_v38 = vpop.permute.xlu0 %1672  ;;  %v1715_v18 = vpop.permute.xlu1 %1714 }
 0x223   : > { %v1877_v36 = vsel %vm1873_vm10, %v1871_v11, %v1715_v18  ;;  %v1864_v1 = vsel %vm1861_vm8, %v1858_v30, %v1673_v38 }
 0x226   : > { %v1735_v8 = vpop.permute.xlu0 %1734  ;;  %v1693_v44 = vpop.permute.xlu1 %1692 }
 0x227   : > { %v1883_v32 = vsel %vm1879_vm11, %v1877_v36, %v1735_v8  ;;  %v1870_v63 = vsel %vm1867_vm9, %v1864_v1, %v1693_v44 }
 0x228   : > { %2026 = vmatpush1.msra.mxu0 %v1883_v32 }
 0x229   : > { %2027 = vmatprep.subr.mxu0 %v1907_v23 }
 0x22a   : > { %v1709_v7 = vpop.permute.xlu1 %1708  ;;  %v1809_v14 = vpop.permute.xlu0 %1808 }
 0x22b   : > { %v1900_v5 = vsel %vm1861_vm8, %v3771_v4, %v1809_v14  ;;  %v1874_v25 = vsel %vm1873_vm10, %v3792_v45, %v1709_v7  ;;  %v2794_v4 = vmov 0   ;;  %v1950_v45 = vcombine.low %v3860_v3, %v3860_v3 }
 0x22c   : > { %2682 = vset.pattern.permute.xlu1 %v2794_v4  ;;  %2683 = vset.pattern.permute.xlu0 %v2794_v4 }
 0x22e   : > { %v1713_v35 = vpop.permute.xlu1 %1712  ;;  %v1829_v57 = vpop.permute.xlu0 %1828 }
 0x22f   : > { %v1876_v46 = vsel %vm1873_vm10, %v1870_v63, %v1713_v35  ;;  %v1905_v21 = vsel %vm1867_vm9, %v1900_v5, %v1829_v57 }
 0x232   : > { %v1733_v34 = vpop.permute.xlu1 %1732 }
 0x233   : > { %v1882_v39 = vsel %vm1879_vm11, %v1876_v46, %v1733_v34 }
 0x234   : > { %2028 = vmatpush1.msra.mxu0 %v1882_v39 }
 0x235   : > { %2029 = vmatprep.subr.mxu0 %v3897_v29  ;;  %v1958_v29 = vpop.permute.xlu0 %1957 }
 0x236   : > { %2030 = vmatpush1.msra.mxu0 %v3900_v43  ;;  %v1729_v17 = vpop.permute.xlu1 %1728  ;;  %v1983_v43 = vsel %vm1843_vm5, %v1950_v45, %v1958_v29 }
 0x237   : > { %2031 = vmatprep.subr.mxu0 %v1905_v21  ;;  %v1880_v9 = vsel %vm1879_vm11, %v1874_v25, %v1729_v17 }
 0x238   : > { %2032 = vmatpush1.msra.mxu0 %v1880_v9 }
 0x239   : > { %2614 = vmatmul.mubr.msk.f32.vlgmr.msra.gmra.mxu0 %vm1990_vm13, %v458_v47  ;;  %v1966_v6 = vpop.permute.xlu0 %1965 }
 0x23a   : > { %v1962_v0 = vpop.permute.xlu1 %1961 }
 0x23b   : > { %v1984_v20 = vsel %vm1849_vm6, %v1983_v43, %v1962_v0  ;;  %vm2515_vm6 = vcmask 1047559  }
 0x23c   : > { %v1985_v31 = vsel %vm1855_vm7, %v1984_v20, %v1966_v6 }
 0x23d   : > { %v1974_v60 = vpop.permute.xlu0 %1973 }
 0x23e   : > { %v1970_v58 = vpop.permute.xlu1 %1969 }
 0x23f   : > { %v1986_v53 = vsel %vm1861_vm8, %v1985_v31, %v1970_v58 }
 0x240   : > { %v1987_v33 = vsel %vm1867_vm9, %v1986_v53, %v1974_v60 }
 0x241   : > { %v1981_v26 = vpop.permute.xlu0 %1980 }
 0x242   : > { %v1978_v56 = vpop.permute.xlu1 %1977 }
 0x243   : > { %v1988_v54 = vsel %vm1873_vm10, %v1987_v33, %v1978_v56 }
 0x244   : > { %v1989_v3 = vsel %vm1879_vm11, %v1988_v54, %v1981_v26 }
 0x2f9   : > { %v2067_v28 = vpop.f32.mrf.mxu0 }
 0x2fa   : > { %v2068_v42 = vadd.f32 %v2067_v28, %v1989_v3 }
 0x2fb   : > { %v2069_v55 = vpop.f32.mrf.mxu0 }
 0x2fc   : > { %2076 = vrot.lane.b32.xlu0 %v2068_v42, %s2792_s22  ;;  %2073 = vrot.lane.b32.xlu1 %v2068_v42, %s2793_s26  ;;  %v2070_v2 = vadd.f32 %v2069_v55, %v1987_v33 }
 0x300   : > { %2082 = vrot.lane.b32.xlu0 %v2068_v42, %s2790_s19  ;;  %2079 = vrot.lane.b32.xlu1 %v2068_v42, %s2791_s20 }
 0x304   : > { %2088 = vrot.lane.b32.xlu0 %v2068_v42, %s2788_s8  ;;  %2085 = vrot.lane.b32.xlu1 %v2068_v42, %s2789_s17  ;;  %s2520_s8 = scalar_lea.sflag [#allocation5], %s2913_s5 }
 0x308   : > { %2095 = vrot.lane.b32.xlu0 %v2070_v2, %s2793_s26  ;;  %2091 = vrot.lane.b32.xlu1 %v2068_v42, %s2787_s7  ;;  %s4058_s7 = scalar_lea.hbm %s4099_s3, %s2616_s10 }
 0x30c   : > { %2101 = vrot.lane.b32.xlu0 %v2070_v2, %s2791_s20  ;;  %2098 = vrot.lane.b32.xlu1 %v2070_v2, %s2792_s22 }
 0x310   : > { %2107 = vrot.lane.b32.xlu0 %v2070_v2, %s2789_s17  ;;  %2104 = vrot.lane.b32.xlu1 %v2070_v2, %s2790_s19  ;;  %s2795_s17 = smov [#allocation6]  }
 0x311   : > { %s2716_s19 = sshll.u32 %s2795_s17, 4  ;;  %s2717_s19 = int_to_ptr.vmem [resolvable:$false] %s2716_s19 }
 0x312   : > { %s2718_s20 = scalar_lea.vmem %s2717_s19, 256  ;;  %p2719_p5 = scmp.lt.s32.totalorder %s2534_s23, %s2717_s19 }
 0x313   : > { %p2720_p7 = scmp.lt.s32.totalorder %s2718_s20, %s2712_s16 }
 0x314   : > { %2455 = vperm.xlu1 %2682, %v459_v16  }
 0x315   : > { %p2721_p8 = por %p2720_p7, %p2719_p5 }
 0x317   : > { %p2722_p10 = pnand %p2721_p8, %p2715_p4 }
 0x36e   : > { %v2077_v22 = vpop.permute.xlu0 %2076  ;;  %v2074_v13 = vpop.permute.xlu1 %2073 }
 0x36f   : > { %v2110_v40 = vcombine.low %v2068_v42, %v2077_v22  ;;  %v2111_v27 = vcombine.high %v2068_v42, %v2077_v22 }
 0x371   : > { %v2118_v8 = vrot.slane %v2110_v40, %v3033_v48  ;;  %v2125_v44 = vrot.slane %v2111_v27, %v3033_v48 }
 0x372   : > { %v2083_v19 = vpop.permute.xlu0 %2082  ;;  %v2080_v52 = vpop.permute.xlu1 %2079 }
 0x373   : > { %v2126_v59 = vcombine.low %v2074_v13, %v2080_v52  ;;  %v2127_v50 = vcombine.high %v2074_v13, %v2080_v52 }
 0x375   : > { %v2134_v38 = vrot.slane %v2126_v59, %v3033_v48  ;;  %v2141_v18 = vrot.slane %v2127_v50, %v3033_v48 }
 0x376   : > { %v2089_v41 = vpop.permute.xlu0 %2088  ;;  %v2086_v49 = vpop.permute.xlu1 %2085 }
 0x377   : > { %v2142_v15 = vcombine.low %v2083_v19, %v2089_v41  ;;  %v2143_v51 = vcombine.high %v2083_v19, %v2089_v41  ;;  %v2174_v24 = vcombine.low %v2118_v8, %v2134_v38  ;;  %v2190_v14 = vcombine.low %v2125_v44, %v2141_v18 }
 0x378   : > { %v2191_v1 = vcombine.high %v2125_v44, %v2141_v18  ;;  %v2175_v17 = vcombine.high %v2118_v8, %v2134_v38 }
 0x379   : > { %v2150_v32 = vrot.slane %v2142_v15, %v3033_v48  ;;  %v2157_v23 = vrot.slane %v2143_v51, %v3033_v48  ;;  %v2182_v45 = vrot.slane %v2174_v24, %v3086_v10  ;;  %v2198_v0 = vrot.slane %v2190_v14, %v3086_v10 }
 0x37a   : > { %v2096_v62 = vpop.permute.xlu0 %2095  ;;  %v2092_v11 = vpop.permute.xlu1 %2091  ;;  %v2205_v20 = vrot.slane %v2191_v1, %v3086_v10  ;;  %v2189_v58 = vrot.slane %v2175_v17, %v3086_v10 }
 0x37b   : > { %v2158_v61 = vcombine.low %v2086_v49, %v2092_v11  ;;  %v2159_v36 = vcombine.high %v2086_v49, %v2092_v11 }
 0x37d   : > { %v2166_v7 = vrot.slane %v2158_v61, %v3033_v48  ;;  %v2173_v37 = vrot.slane %v2159_v36, %v3033_v48 }
 0x37e   : > { %v2102_v35 = vpop.permute.xlu0 %2101  ;;  %v2099_v30 = vpop.permute.xlu1 %2098 }
 0x37f   : > { %v2206_v63 = vcombine.low %v2150_v32, %v2166_v7  ;;  %v2222_v46 = vcombine.low %v2157_v23, %v2173_v37  ;;  %v2223_v34 = vcombine.high %v2157_v23, %v2173_v37  ;;  %v2262_v57 = vcombine.low %v2096_v62, %v2102_v35 }
 0x380   : > { %v2263_v39 = vcombine.high %v2096_v62, %v2102_v35  ;;  %v2246_v5 = vcombine.low %v2070_v2, %v2099_v30  ;;  %v2247_v25 = vcombine.high %v2070_v2, %v2099_v30  ;;  %v2207_v21 = vcombine.high %v2150_v32, %v2166_v7 }
 0x381   : > { %v2214_v47 = vrot.slane %v2206_v63, %v3086_v10  ;;  %v2230_v9 = vrot.slane %v2222_v46, %v3086_v10  ;;  %v2237_v4 = vrot.slane %v2223_v34, %v3086_v10  ;;  %v2270_v29 = vrot.slane %v2262_v57, %v3033_v48 }
 0x382   : > { %v2254_v43 = vrot.slane %v2246_v5, %v3033_v48  ;;  %v2277_v6 = vrot.slane %v2263_v39, %v3033_v48  ;;  %v2261_v31 = vrot.slane %v2247_v25, %v3033_v48  ;;  %v2221_v53 = vrot.slane %v2207_v21, %v3086_v10  ;;  %v2108_v60 = vpop.permute.xlu0 %2107  ;;  %v2105_v3 = vpop.permute.xlu1 %2104 }
 0x383   : > { %v2238_v33 = vcombine.low %v2182_v45, %v2214_v47  ;;  %v2242_v56 = vcombine.low %v2198_v0, %v2230_v9  ;;  %v2243_v54 = vcombine.high %v2198_v0, %v2230_v9  ;;  %v2244_v26 = vcombine.low %v2205_v20, %v2237_v4 }
 0x384   : > { %v2239_v28 = vcombine.high %v2182_v45, %v2214_v47  ;;  %v2245_v42 = vcombine.high %v2205_v20, %v2237_v4  ;;  %v2308_v55 = vcombine.low %v2254_v43, %v2270_v29  ;;  %v2309_v2 = vcombine.high %v2254_v43, %v2270_v29 }
 0x385   : > { %v2324_v16 = vcombine.low %v2261_v31, %v2277_v6  ;;  %v2325_v22 = vcombine.high %v2261_v31, %v2277_v6  ;;  %v2293_v13 = vcombine.high %v2108_v60, %v4120_v12  ;;  %v2300_v19 = vrot.slane %v2108_v60, %v3033_v48 }
 0x386   : > { %v2240_v52 = vcombine.low %v2189_v58, %v2221_v53  ;;  %v2241_v59 = vcombine.high %v2189_v58, %v2221_v53  ;;  %v2278_v50 = vcombine.high %v2105_v3, %v4120_v12  ;;  %v2285_v41 = vrot.slane %v2105_v3, %v3033_v48 }
 0x387   : > { %v2417_v49 = vsel %vm1843_vm5, %v2242_v56, -inf  ;;  %v2426_v40 = vsel %vm1843_vm5, %v2243_v54, -inf  ;;  %v2435_v27 = vsel %vm1843_vm5, %v2244_v26, -inf  ;;  %v2307_v15 = vrot.slane %v2293_v13, %v3033_v48 }
 0x388   : > { %v2444_v51 = vsel %vm1843_vm5, %v2245_v42, -inf  ;;  %v2292_v38 = vrot.slane %v2278_v50, %v3033_v48  ;;  %v2340_v18 = vcombine.low %v2285_v41, %v2300_v19  ;;  %v2341_v62 = vcombine.high %v2285_v41, %v2300_v19 }
 0x389   : > { %v2316_v11 = vrot.slane %v2308_v55, %v3086_v10  ;;  %v2323_v12 = vrot.slane %v2309_v2, %v3086_v10  ;;  %v2332_v61 = vrot.slane %v2324_v16, %v3086_v10  ;;  %v2339_v36 = vrot.slane %v2325_v22, %v3086_v10 }
 0x38a   : > { %v2348_v8 = vrot.slane %v2340_v18, %v3086_v10  ;;  %v2355_v44 = vrot.slane %v2341_v62, %v3086_v10  ;;  %v2356_v32 = vcombine.low %v2292_v38, %v2307_v15  ;;  %v2357_v23 = vcombine.high %v2292_v38, %v2307_v15 }
 0x38b   : > { %v2380_v7 = vsel %vm1843_vm5, %v2238_v33, -inf  ;;  %v2390_v48 = vsel %vm1843_vm5, %v2239_v28, -inf  ;;  %v2399_v37 = vsel %vm1843_vm5, %v2240_v52, -inf  ;;  %v2408_v24 = vsel %vm1843_vm5, %v2241_v59, -inf }
 0x38c   : > { %v2364_v14 = vrot.slane %v2356_v32, %v3086_v10  ;;  %v2371_v35 = vrot.slane %v2357_v23, %v3086_v10  ;;  %v2372_v30 = vcombine.low %v2316_v11, %v2348_v8  ;;  %v2373_v1 = vcombine.high %v2316_v11, %v2348_v8 }
 0x38d   : > { %v2374_v46 = vcombine.low %v2323_v12, %v2355_v44  ;;  %v2375_v34 = vcombine.high %v2323_v12, %v2355_v44 }
 0x38e   : > { %v2376_v5 = vcombine.low %v2332_v61, %v2364_v14  ;;  %v2377_v25 = vcombine.high %v2332_v61, %v2364_v14  ;;  %v2378_v17 = vcombine.low %v2339_v36, %v2371_v35  ;;  %v2379_v21 = vcombine.high %v2339_v36, %v2371_v35 }
 0x38f   : > { %v4031_v63 = vpop.permute.xlu1 %2455  ;;  %v2382_v47 = vsel %vm2381_vm14, %v2372_v30, -inf  ;;  %v2391_v9 = vsel %vm2381_vm14, %v2373_v1, -inf  ;;  %v2400_v10 = vsel %vm2381_vm14, %v2374_v46, -inf  ;;  %v2409_v4 = vsel %vm2381_vm14, %v2375_v34, -inf }
 0x390   : > { %v2457_v57 = vrot.slane %v4031_v63, 1  ;;  %v2458_v39 = vrot.slane %v4031_v63, 2  ;;  %v2383_v45 = vmax.f32 %v2380_v7, %v2382_v47  ;;  %v2392_v29 = vmax.f32 %v2390_v48, %v2391_v9 }
 0x391   : > { %v2401_v43 = vmax.f32 %v2399_v37, %v2400_v10  ;;  %v2410_v0 = vmax.f32 %v2408_v24, %v2409_v4  ;;  %v2418_v20 = vsel %vm2381_vm14, %v2376_v5, -inf  ;;  %v2427_v6 = vsel %vm2381_vm14, %v2377_v25, -inf }
 0x392   : > { %v2436_v31 = vsel %vm2381_vm14, %v2378_v17, -inf  ;;  %v2445_v58 = vsel %vm2381_vm14, %v2379_v21, -inf  ;;  %v2384_v53 = vrot.slane %v2383_v45, 4  ;;  %v2393_v60 = vrot.slane %v2392_v29, 4 }
 0x393   : > { %v2402_v33 = vrot.slane %v2401_v43, 4  ;;  %v2411_v56 = vrot.slane %v2410_v0, 4  ;;  %v2419_v54 = vmax.f32 %v2417_v49, %v2418_v20  ;;  %v2428_v26 = vmax.f32 %v2426_v40, %v2427_v6 }
 0x394   : > { %v2437_v3 = vmax.f32 %v2435_v27, %v2436_v31  ;;  %v2446_v28 = vmax.f32 %v2444_v51, %v2445_v58  ;;  %v2385_v42 = vmax.f32 %v2383_v45, %v2384_v53  ;;  %v2394_v55 = vmax.f32 %v2392_v29, %v2393_v60 }
 0x395   : > { %v2403_v2 = vmax.f32 %v2401_v43, %v2402_v33  ;;  %v2412_v16 = vmax.f32 %v2410_v0, %v2411_v56  ;;  %v2420_v22 = vrot.slane %v2419_v54, 4  ;;  %v2429_v13 = vrot.slane %v2428_v26, 4 }
 0x396   : > { %v2438_v19 = vrot.slane %v2437_v3, 4  ;;  %v2447_v52 = vrot.slane %v2446_v28, 4  ;;  %v2386_v59 = vrot.slane %v2385_v42, 2  ;;  %v2395_v50 = vrot.slane %v2394_v55, 2 }
 0x397   : > { %v2404_v41 = vrot.slane %v2403_v2, 2  ;;  %v2413_v15 = vrot.slane %v2412_v16, 2  ;;  %v2421_v38 = vmax.f32 %v2419_v54, %v2420_v22  ;;  %v2430_v18 = vmax.f32 %v2428_v26, %v2429_v13 }
 0x398   : > { %v2439_v62 = vmax.f32 %v2437_v3, %v2438_v19  ;;  %v2448_v11 = vmax.f32 %v2446_v28, %v2447_v52  ;;  %v2387_v49 = vmax.f32 %v2385_v42, %v2386_v59  ;;  %v2396_v40 = vmax.f32 %v2394_v55, %v2395_v50 }
 0x399   : > { %v2405_v27 = vmax.f32 %v2403_v2, %v2404_v41  ;;  %v2414_v51 = vmax.f32 %v2412_v16, %v2413_v15  ;;  %v2422_v12 = vrot.slane %v2421_v38, 2  ;;  %v2431_v61 = vrot.slane %v2430_v18, 2 }
 0x39a   : > { %v2440_v36 = vrot.slane %v2439_v62, 2  ;;  %v2449_v8 = vrot.slane %v2448_v11, 2  ;;  %v2388_v44 = vrot.slane %v2387_v49, 1  ;;  %v2397_v32 = vrot.slane %v2396_v40, 1 }
 0x39b   : > { %v2406_v23 = vrot.slane %v2405_v27, 1  ;;  %v2415_v7 = vrot.slane %v2414_v51, 1  ;;  %v2423_v48 = vmax.f32 %v2421_v38, %v2422_v12  ;;  %v2432_v37 = vmax.f32 %v2430_v18, %v2431_v61 }
 0x39c   : > { %v2441_v24 = vmax.f32 %v2439_v62, %v2440_v36  ;;  %v2450_v14 = vmax.f32 %v2448_v11, %v2449_v8  ;;  %v2389_v35 = vmax.f32 %v2387_v49, %v2388_v44  ;;  %v2398_v30 = vmax.f32 %v2396_v40, %v2397_v32 }
 0x39d   : > { %v2407_v1 = vmax.f32 %v2405_v27, %v2406_v23  ;;  %v2416_v46 = vmax.f32 %v2414_v51, %v2415_v7  ;;  %v2424_v34 = vrot.slane %v2423_v48, 1  ;;  %v2433_v5 = vrot.slane %v2432_v37, 1 }
 0x39e   : > { %v2442_v25 = vrot.slane %v2441_v24, 1  ;;  %v2451_v17 = vrot.slane %v2450_v14, 1  ;;  %v2459_v21 = vrot.slane %v4031_v63, 3  ;;  %v2460_v47 = vrot.slane %v4031_v63, 4 }
 0x39f   : > { %v2461_v9 = vrot.slane %v4031_v63, 5  ;;  %v2462_v10 = vrot.slane %v4031_v63, 6  ;;  %v2425_v4 = vmax.f32 %v2423_v48, %v2424_v34  ;;  %v2434_v45 = vmax.f32 %v2432_v37, %v2433_v5 }
 0x3a0   : > { %v2443_v29 = vmax.f32 %v2441_v24, %v2442_v25  ;;  %v2463_v43 = vrot.slane %v4031_v63, 7  ;;  %v2472_v0 = vadd.f32 %v4031_v63, %v2389_v35  ;;  %v2473_v20 = vadd.f32 %v2457_v57, %v2398_v30 }
 0x3a1   : > { %v2474_v6 = vadd.f32 %v2458_v39, %v2407_v1  ;;  %v2475_v31 = vadd.f32 %v2459_v21, %v2416_v46  ;;  %v2476_v58 = vadd.f32 %v2460_v47, %v2425_v4  ;;  %v2477_v53 = vadd.f32 %v2461_v9, %v2434_v45 }
 0x3a2   : > { %v2452_v60 = vmax.f32 %v2450_v14, %v2451_v17  ;;  %v2478_v33 = vadd.f32 %v2462_v10, %v2443_v29  ;;  %v2481_v56 = vmax.f32 %v2473_v20, 0.0  ;;  %v2480_v42 = vmax.f32 %v2472_v0, 0.0 }
 0x3a3   : > { %v2482_v54 = vmax.f32 %v2474_v6, 0.0  ;;  %v2483_v26 = vmax.f32 %v2475_v31, 0.0  ;;  %v2484_v3 = vmax.f32 %v2476_v58, 0.0  ;;  %v2485_v55 = vmax.f32 %v2477_v53, 0.0 }
 0x3a4   : > { %v2479_v28 = vadd.f32 %v2463_v43, %v2452_v60  ;;  %v2496_v57 = vrot.slane %v2481_v56, 7  ;;  %v2486_v39 = vmax.f32 %v2478_v33, 0.0 }
 0x3a5   : > { %v2499_v2 = vrot.slane %v2482_v54, 6  ;;  %v2505_v63 = vrot.slane %v2484_v3, 4  ;;  %v2502_v22 = vrot.slane %v2483_v26, 5  ;;  %v2508_v52 = vrot.slane %v2485_v55, 3 }
 0x3a6   : > { %v2498_v16 = vsel %vm2497_vm15, %v2496_v57, %v2480_v42  ;;  %v2487_v13 = vmax.f32 %v2479_v28, 0.0  ;;  %v2511_v41 = vrot.slane %v2486_v39, 2 }
 0x3a7   : > { %v2501_v19 = vsel %vm2500_vm0, %v2499_v2, %v2498_v16 }
 0x3a8   : > { %v2504_v59 = vsel %vm2503_vm1, %v2502_v22, %v2501_v19  ;;  %v2514_v38 = vrot.slane %v2487_v13, 1 }
 0x3a9   : > { %v2507_v50 = vsel %vm2506_vm2, %v2505_v63, %v2504_v59 }
 0x3aa   : > { %v2510_v15 = vsel %vm2509_vm3, %v2508_v52, %v2507_v50 }
 0x3ab   : > { %v2513_v18 = vsel %vm2512_vm4, %v2511_v41, %v2510_v15 }
 0x3ac   : > { %v2516_v62 = vsel %vm2515_vm6, %v2514_v38, %v2513_v18 }
 0x3ad   : > { %2518 = vst.msk [vmem:[%s188_s11] sm:$0xff] %vm1843_vm5, %v2516_v62 }
 0x3ae   : > { %2725 = shalt.err (!%p2722_p10)
}
 0x3af   : > { %s2726_s22 = scalar_lea.hbm %s4058_s7, 128  ;;  %s2730_s27 = scalar_lea.hbm %s4099_s3, 256 }
 0x3b0   : > { %p2727_p0 = scmp.ne.s32.totalorder %s4058_s7, %s2726_s22  ;;  %p2731_p1 = scmp.lt.s32.totalorder %s4058_s7, %s4099_s3 }
 0x3b1   : > { %p2732_p3 = scmp.lt.s32.totalorder %s2730_s27, %s2726_s22 }
 0x3b2   : > { %p2728_p2 = pnand %p2727_p0, %p4135_p12 }
 0x3b3   : > { %p2733_p6 = por %p2732_p3, %p2731_p1 }
 0x3b4   : > { %p2729_p9 = pneg %p2728_p2 }
 0x3b6   : > { %p2734_p11 = pnand %p2733_p6, %p2729_p9 }
 0x3b8   : > { %2737 = shalt.err (!%p2734_p11)
}
 0x3b9   : > { %2622 = dma.vmem_to_hbm [thread:$0]  (%p4135_p12), %s2534_s23, 128, %s4058_s7, %s2520_s8  }
 0x3ba PF: > { %s2545_s30 = sand.u32 1, %s2764_s12   ;;  %p4136_p13 = scmp.ne.s32.totalorder %s4111_s25, 0 }
 0x3bb   : > { %p4137_p4 = scmp.ge.s32.totalorder %s2776_s15, 2  ;;  %s2546_s9 = scalar_lea.sflag [#allocation5], %s2545_s30 }
 0x3bd   : > { %p2629_p5 = pnand %p4137_p4, %p4136_p13 }
 0x3bf   : > { %p2630_p7 = pneg %p2629_p5 }
 0x3c1   : > { %2759 = dma.done.wait (%p2630_p7), %s2546_s9, 128  }
 0x3c2   : > { %2761 = vsyncadd (%p2630_p7), %s2546_s9, 4294967168  ;;  %p16_p8 = scmp.ge.s32.totalorder %s2841_s18, 4   ;;  %s4138_s12 = smov %s2768_s13 }
 0x3c3   : > { %s4139_s13 = smov %s2772_s14  ;;  %s4140_s14 = smov %s2853_s21 }
 0x3c4   : > { %s4141_s15 = smov %s2841_s18  ;;  %18 = sbr.rel (!%p16_p8) target bundleno = 5 (0x5), region = 77 }
 0x3c9   :  { %2551 = vsyncpa [#allocation4], 1 }
 0x3ca   :  { %2553 = vsyncpa [#allocation4 + $0x1], 1 }
 0x3cb   :  { %2554 = vsyncpa [#allocation5], 1 }
 0x3cc   :  { %2556 = vsyncpa [#allocation5 + $0x1], 1 }

</bundles_post_ra>
